<compile_context>
chip_gen: v7x
topology: tpu7x:2x2x1
jax: 0.10.0
libtpu: 0.0.40
codegen_flags: <defaults>
</compile_context>

<pallas_src>
import jax
import jax.numpy as jnp
from jax.experimental import pallas as pl
from jax.experimental.pallas import tpu as pltpu

# ---------------- model config (small, synthetic) ----------------
VOCAB = 100
TYPE_VOCAB = 2
MAX_POS = 64
HIDDEN = 32
NUM_HEADS = 4
HEAD_DIM = HIDDEN // NUM_HEADS
INTERMEDIATE = 64
NUM_LAYERS = 2
LN_EPS = 1e-12


def _layernorm(x, g, b, eps=LN_EPS):
    # x: (S, H) f32; g, b: (1, H) f32
    mu = jnp.mean(x, axis=-1, keepdims=True)
    var = jnp.mean((x - mu) ** 2, axis=-1, keepdims=True)
    return (x - mu) * jax.lax.rsqrt(var + eps) * g + b


# ---------------- fused Pallas kernel: emb-LN + L encoder layers + pooler ----------------
def fused_bert_kernel(x_ref, extmask_ref, embg_ref, embb_ref,
                      wq_ref, bq_ref, wk_ref, bk_ref, wv_ref, bv_ref,
                      wo_ref, bo_ref, ln1g_ref, ln1b_ref,
                      w1_ref, b1_ref, w2_ref, b2_ref, ln2g_ref, ln2b_ref,
                      pw_ref, pb_ref, out_ref):
    S = x_ref.shape[1]

    # embedding layernorm (dropout is identity in eval mode)
    x = _layernorm(x_ref[0], embg_ref[...], embb_ref[...])           # (S, H) f32

    # additive attention mask, broadcast to (S, S) ONCE (hoisted out of head/layer loops)
    ext_mask = jnp.broadcast_to(extmask_ref[0], (S, S))              # (S, S) f32

    scale = HEAD_DIM ** -0.5
    for l in range(NUM_LAYERS):                                      # static, unrolled
        x_bf = x.astype(jnp.bfloat16)
        q = (jnp.dot(x_bf, wq_ref[l], preferred_element_type=jnp.float32)
             + bq_ref[l]).astype(jnp.bfloat16)
        k = (jnp.dot(x_bf, wk_ref[l], preferred_element_type=jnp.float32)
             + bk_ref[l]).astype(jnp.bfloat16)
        v = (jnp.dot(x_bf, wv_ref[l], preferred_element_type=jnp.float32)
             + bv_ref[l]).astype(jnp.bfloat16)

        # per-head attention; context accumulated into one (S, H) buffer, Wo applied ONCE after.
        ctx_parts = []
        for h in range(NUM_HEADS):                                   # static per-head loop
            sl = slice(h * HEAD_DIM, (h + 1) * HEAD_DIM)
            scores = jnp.dot(q[:, sl], k[:, sl].T,
                             preferred_element_type=jnp.float32) * scale + ext_mask
            m = jnp.max(scores, axis=-1, keepdims=True)
            p = jnp.exp(scores - m)
            p = p * pl.reciprocal(jnp.sum(p, axis=-1, keepdims=True), approx=True)
            ctx_parts.append(jnp.dot(p.astype(jnp.bfloat16), v[:, sl],
                                     preferred_element_type=jnp.float32))
        ctx = jnp.concatenate(ctx_parts, axis=-1).astype(jnp.bfloat16)  # (S, H)

        attn_out = jnp.dot(ctx, wo_ref[l],
                           preferred_element_type=jnp.float32) + bo_ref[l]
        x1 = _layernorm(x + attn_out, ln1g_ref[l], ln1b_ref[l])

        h1 = jnp.dot(x1.astype(jnp.bfloat16), w1_ref[l],
                     preferred_element_type=jnp.float32) + b1_ref[l]
        # NOTE: tanh-approx GELU (gelu_new). Original pytorch_pretrained_bert uses exact-erf
        # GELU; switch to jax.nn.gelu(h1, approximate=False) if matching that checkpoint.
        h1 = jax.nn.gelu(h1)
        h2 = jnp.dot(h1.astype(jnp.bfloat16), w2_ref[l],
                     preferred_element_type=jnp.float32) + b2_ref[l]
        x = _layernorm(x1 + h2, ln2g_ref[l], ln2b_ref[l])

    # BERT pooler: tanh(CLS @ W + b);  classifier head is Identity.
    cls = x[0:1, :].astype(jnp.bfloat16)                             # (1, H)
    pooled = jnp.tanh(jnp.dot(cls, pw_ref[...],
                              preferred_element_type=jnp.float32) + pb_ref[...])
    out_ref[0] = pooled


# ---------------- full forward (ClinicalBERTEncoder.forward) ----------------
def clinical_bert_encoder(input_ids, segment_ids, input_mask, params):
    B, S = input_ids.shape
    H, I, L = HIDDEN, INTERMEDIATE, NUM_LAYERS

    # embedding lookups (glue)
    word = jnp.take(params['word_emb'], input_ids, axis=0)           # (B, S, H)
    pos = params['pos_emb'][:S][None, :, :]                          # (1, S, H)
    tok = jnp.take(params['tok_emb'], segment_ids, axis=0)           # (B, S, H)
    x = (word + pos + tok).astype(jnp.float32)                       # (B, S, H)

    # BERT-style additive attention mask, precomputed once in the wrapper
    ext_mask = ((1.0 - input_mask.astype(jnp.float32)) * -10000.0)[:, None, :]  # (B,1,S)

    full2 = lambda shp: pl.BlockSpec(shp, lambda i: (0, 0))
    full3 = lambda shp: pl.BlockSpec(shp, lambda i: (0, 0, 0))
    lw = params['stacked']

    in_specs = [
        pl.BlockSpec((1, S, H), lambda i: (i, 0, 0)),                # x (per-batch block)
        pl.BlockSpec((1, 1, S), lambda i: (i, 0, 0)),                # additive mask
        full2((1, H)), full2((1, H)),                                # emb LN g/b
        full3((L, H, H)), full3((L, 1, H)),                          # wq, bq
        full3((L, H, H)), full3((L, 1, H)),                          # wk, bk
        full3((L, H, H)), full3((L, 1, H)),                          # wv, bv
        full3((L, H, H)), full3((L, 1, H)),                          # wo, bo
        full3((L, 1, H)), full3((L, 1, H)),                          # ln1 g/b
        full3((L, H, I)), full3((L, 1, I)),                          # ffn in
        full3((L, I, H)), full3((L, 1, H)),                          # ffn out
        full3((L, 1, H)), full3((L, 1, H)),                          # ln2 g/b
        full2((H, H)), full2((1, H)),                                # pooler
    ]

    pooled = pl.pallas_call(
        fused_bert_kernel,
        out_shape=jax.ShapeDtypeStruct((B, 1, H), jnp.float32),
        grid=(B,),
        in_specs=in_specs,
        out_specs=pl.BlockSpec((1, 1, H), lambda i: (i, 0, 0)),
        compiler_params=pltpu.CompilerParams(dimension_semantics=("parallel",)),
    )(x, ext_mask, params['emb_ln_g'], params['emb_ln_b'],
      lw['wq'], lw['bq'], lw['wk'], lw['bk'], lw['wv'], lw['bv'],
      lw['wo'], lw['bo'], lw['ln1_g'], lw['ln1_b'],
      lw['w1'], lw['b1'], lw['w2'], lw['b2'], lw['ln2_g'], lw['ln2_b'],
      params['pool_w'], params['pool_b'])

    return pooled[:, 0, :]                                           # (B, H)


# ---------------- deterministic parameter init (synthetic; no checkpoint I/O) ----------------
# TODO(synk): real load_pretrained_BERT_classifier() weights cannot be loaded in-script.
def init_params(key):
    keys = jax.random.split(key, 8 + NUM_LAYERS * 8)
    kit = iter(keys)

    def nrm(shape, dtype=jnp.float32):
        return (0.02 * jax.random.normal(next(kit), shape)).astype(dtype)

    H, I, L = HIDDEN, INTERMEDIATE, NUM_LAYERS
    params = {
        'word_emb': nrm((VOCAB, H)),
        'pos_emb': nrm((MAX_POS, H)),
        'tok_emb': nrm((TYPE_VOCAB, H)),
        'emb_ln_g': jnp.ones((1, H), jnp.float32),
        'emb_ln_b': jnp.zeros((1, H), jnp.float32),
        'pool_w': nrm((H, H), jnp.bfloat16),        # bf16 MXU operand
        'pool_b': jnp.zeros((1, H), jnp.float32),
    }
    # per-layer weights stacked on a leading L axis (bf16 matmul weights, f32 bias/LN)
    params['stacked'] = {
        'wq': nrm((L, H, H), jnp.bfloat16), 'bq': jnp.zeros((L, 1, H), jnp.float32),
        'wk': nrm((L, H, H), jnp.bfloat16), 'bk': jnp.zeros((L, 1, H), jnp.float32),
        'wv': nrm((L, H, H), jnp.bfloat16), 'bv': jnp.zeros((L, 1, H), jnp.float32),
        'wo': nrm((L, H, H), jnp.bfloat16), 'bo': jnp.zeros((L, 1, H), jnp.float32),
        'ln1_g': jnp.ones((L, 1, H), jnp.float32), 'ln1_b': jnp.zeros((L, 1, H), jnp.float32),
        'w1': nrm((L, H, I), jnp.bfloat16), 'b1': jnp.zeros((L, 1, I), jnp.float32),
        'w2': nrm((L, I, H), jnp.bfloat16), 'b2': jnp.zeros((L, 1, H), jnp.float32),
        'ln2_g': jnp.ones((L, 1, H), jnp.float32), 'ln2_b': jnp.zeros((L, 1, H), jnp.float32),
    }
    return params


if __name__ == "__main__":
    B, S = 2, 8
    key = jax.random.PRNGKey(0)
    pkey, ikey = jax.random.split(key)
    params = init_params(pkey)

    input_ids = jax.random.randint(ikey, (B, S), 0, VOCAB, dtype=jnp.int32)
    segment_ids = jnp.zeros((B, S), jnp.int32)
    # second sequence has 2 padding positions
    input_mask = jnp.array([[1] * S, [1] * (S - 2) + [0] * 2], dtype=jnp.int32)

    forward = jax.jit(clinical_bert_encoder)
    embeds = forward(input_ids, segment_ids, input_mask, params)
    embeds = jax.block_until_ready(embeds)
    assert embeds.shape == (B, HIDDEN) and embeds.dtype == jnp.float32
    print("KERNEL_OK")
</pallas_src>

<mosaic_0001>
module attributes {stable_mosaic.version = 11 : i64} {
  func.func @fused_bert_kernel(%arg0: i32, %arg1: memref<1x8x32xf32, #tpu.memory_space<vmem>>, %arg2: memref<1x1x8xf32, #tpu.memory_space<vmem>>, %arg3: memref<1x32xf32, #tpu.memory_space<vmem>>, %arg4: memref<1x32xf32, #tpu.memory_space<vmem>>, %arg5: memref<2x32x32xbf16, #tpu.memory_space<vmem>>, %arg6: memref<2x1x32xf32, #tpu.memory_space<vmem>>, %arg7: memref<2x32x32xbf16, #tpu.memory_space<vmem>>, %arg8: memref<2x1x32xf32, #tpu.memory_space<vmem>>, %arg9: memref<2x32x32xbf16, #tpu.memory_space<vmem>>, %arg10: memref<2x1x32xf32, #tpu.memory_space<vmem>>, %arg11: memref<2x32x32xbf16, #tpu.memory_space<vmem>>, %arg12: memref<2x1x32xf32, #tpu.memory_space<vmem>>, %arg13: memref<2x1x32xf32, #tpu.memory_space<vmem>>, %arg14: memref<2x1x32xf32, #tpu.memory_space<vmem>>, %arg15: memref<2x32x64xbf16, #tpu.memory_space<vmem>>, %arg16: memref<2x1x64xf32, #tpu.memory_space<vmem>>, %arg17: memref<2x64x32xbf16, #tpu.memory_space<vmem>>, %arg18: memref<2x1x32xf32, #tpu.memory_space<vmem>>, %arg19: memref<2x1x32xf32, #tpu.memory_space<vmem>>, %arg20: memref<2x1x32xf32, #tpu.memory_space<vmem>>, %arg21: memref<32x32xbf16, #tpu.memory_space<vmem>>, %arg22: memref<1x32xf32, #tpu.memory_space<vmem>>, %arg23: memref<1x1x32xf32, #tpu.memory_space<vmem>>) attributes {dimension_semantics = [#tpu.dimension_semantics<parallel>], iteration_bounds = array<i64: 2>, scalar_prefetch = 0 : i64, scratch_operands = 0 : i64, tpu.core_type = #tpu.core_type<tc>, window_params = [{transform_indices = @transform_0, window_bounds = array<i64: 1, 8, 32>}, {transform_indices = @transform_1, window_bounds = array<i64: 1, 1, 8>}, {pipeline_mode = #tpu.pipeline_mode<synchronous>, transform_indices = @transform_2, window_bounds = array<i64: 1, 32>}, {pipeline_mode = #tpu.pipeline_mode<synchronous>, transform_indices = @transform_3, window_bounds = array<i64: 1, 32>}, {pipeline_mode = #tpu.pipeline_mode<synchronous>, transform_indices = @transform_4, window_bounds = array<i64: 2, 32, 32>}, {pipeline_mode = #tpu.pipeline_mode<synchronous>, transform_indices = @transform_5, window_bounds = array<i64: 2, 1, 32>}, {pipeline_mode = #tpu.pipeline_mode<synchronous>, transform_indices = @transform_6, window_bounds = array<i64: 2, 32, 32>}, {pipeline_mode = #tpu.pipeline_mode<synchronous>, transform_indices = @transform_7, window_bounds = array<i64: 2, 1, 32>}, {pipeline_mode = #tpu.pipeline_mode<synchronous>, transform_indices = @transform_8, window_bounds = array<i64: 2, 32, 32>}, {pipeline_mode = #tpu.pipeline_mode<synchronous>, transform_indices = @transform_9, window_bounds = array<i64: 2, 1, 32>}, {pipeline_mode = #tpu.pipeline_mode<synchronous>, transform_indices = @transform_10, window_bounds = array<i64: 2, 32, 32>}, {pipeline_mode = #tpu.pipeline_mode<synchronous>, transform_indices = @transform_11, window_bounds = array<i64: 2, 1, 32>}, {pipeline_mode = #tpu.pipeline_mode<synchronous>, transform_indices = @transform_12, window_bounds = array<i64: 2, 1, 32>}, {pipeline_mode = #tpu.pipeline_mode<synchronous>, transform_indices = @transform_13, window_bounds = array<i64: 2, 1, 32>}, {pipeline_mode = #tpu.pipeline_mode<synchronous>, transform_indices = @transform_14, window_bounds = array<i64: 2, 32, 64>}, {pipeline_mode = #tpu.pipeline_mode<synchronous>, transform_indices = @transform_15, window_bounds = array<i64: 2, 1, 64>}, {pipeline_mode = #tpu.pipeline_mode<synchronous>, transform_indices = @transform_16, window_bounds = array<i64: 2, 64, 32>}, {pipeline_mode = #tpu.pipeline_mode<synchronous>, transform_indices = @transform_17, window_bounds = array<i64: 2, 1, 32>}, {pipeline_mode = #tpu.pipeline_mode<synchronous>, transform_indices = @transform_18, window_bounds = array<i64: 2, 1, 32>}, {pipeline_mode = #tpu.pipeline_mode<synchronous>, transform_indices = @transform_19, window_bounds = array<i64: 2, 1, 32>}, {pipeline_mode = #tpu.pipeline_mode<synchronous>, transform_indices = @transform_20, window_bounds = array<i64: 32, 32>}, {pipeline_mode = #tpu.pipeline_mode<synchronous>, transform_indices = @transform_21, window_bounds = array<i64: 1, 32>}, {transform_indices = @transform_22, window_bounds = array<i64: 1, 1, 32>}]} {
    %c0 = arith.constant 0 : index
    %c0_0 = arith.constant 0 : index
    %c0_1 = arith.constant 0 : index
    %0 = vector.load %arg1[%c0, %c0_0, %c0_1] : memref<1x8x32xf32, #tpu.memory_space<vmem>>, vector<1x8x32xf32>
    %1 = vector.shape_cast %0 : vector<1x8x32xf32> to vector<8x32xf32>
    %c0_2 = arith.constant 0 : index
    %c0_3 = arith.constant 0 : index
    %2 = vector.load %arg3[%c0_2, %c0_3] : memref<1x32xf32, #tpu.memory_space<vmem>>, vector<1x32xf32>
    %c0_4 = arith.constant 0 : index
    %c0_5 = arith.constant 0 : index
    %3 = vector.load %arg4[%c0_4, %c0_5] : memref<1x32xf32, #tpu.memory_space<vmem>>, vector<1x32xf32>
    %cst = arith.constant dense<0.000000e+00> : vector<8xf32>
    %4 = vector.multi_reduction <add>, %1, %cst [1] : vector<8x32xf32> to vector<8xf32>
    %5 = vector.shape_cast %4 : vector<8xf32> to vector<8x1xf32>
    %cst_6 = arith.constant 3.200000e+01 : f32
    %6 = vector.broadcast %cst_6 : f32 to vector<8x1xf32>
    %7 = arith.divf %5, %6 : vector<8x1xf32>
    %8 = vector.broadcast %7 : vector<8x1xf32> to vector<8x32xf32>
    %9 = arith.subf %1, %8 : vector<8x32xf32>
    %10 = arith.mulf %9, %9 : vector<8x32xf32>
    %cst_7 = arith.constant dense<0.000000e+00> : vector<8xf32>
    %11 = vector.multi_reduction <add>, %10, %cst_7 [1] : vector<8x32xf32> to vector<8xf32>
    %12 = vector.shape_cast %11 : vector<8xf32> to vector<8x1xf32>
    %cst_8 = arith.constant 3.200000e+01 : f32
    %13 = vector.broadcast %cst_8 : f32 to vector<8x1xf32>
    %14 = arith.divf %12, %13 : vector<8x1xf32>
    %15 = vector.broadcast %7 : vector<8x1xf32> to vector<8x32xf32>
    %16 = arith.subf %1, %15 : vector<8x32xf32>
    %cst_9 = arith.constant 9.99999996E-13 : f32
    %17 = vector.broadcast %cst_9 : f32 to vector<8x1xf32>
    %18 = arith.addf %14, %17 : vector<8x1xf32>
    %19 = math.rsqrt %18 : vector<8x1xf32>
    %20 = vector.broadcast %19 : vector<8x1xf32> to vector<8x32xf32>
    %21 = arith.mulf %16, %20 : vector<8x32xf32>
    %22 = vector.broadcast %2 : vector<1x32xf32> to vector<8x32xf32>
    %23 = arith.mulf %21, %22 : vector<8x32xf32>
    %24 = vector.broadcast %3 : vector<1x32xf32> to vector<8x32xf32>
    %25 = arith.addf %23, %24 : vector<8x32xf32>
    %c0_10 = arith.constant 0 : index
    %c0_11 = arith.constant 0 : index
    %c0_12 = arith.constant 0 : index
    %26 = vector.load %arg2[%c0_10, %c0_11, %c0_12] : memref<1x1x8xf32, #tpu.memory_space<vmem>>, vector<1x1x8xf32>
    %27 = vector.shape_cast %26 : vector<1x1x8xf32> to vector<1x8xf32>
    %28 = vector.shape_cast %27 : vector<1x8xf32> to vector<1x8xf32>
    %29 = vector.broadcast %28 : vector<1x8xf32> to vector<8x8xf32>
    %30 = arith.truncf %25 : vector<8x32xf32> to vector<8x32xbf16>
    %c0_13 = arith.constant 0 : index
    %c0_14 = arith.constant 0 : index
    %c0_15 = arith.constant 0 : index
    %31 = vector.load %arg5[%c0_13, %c0_14, %c0_15] : memref<2x32x32xbf16, #tpu.memory_space<vmem>>, vector<1x32x32xbf16>
    %32 = vector.shape_cast %31 : vector<1x32x32xbf16> to vector<32x32xbf16>
    %cst_16 = arith.constant dense<0.000000e+00> : vector<8x32xf32>
    %33 = tpu.matmul %30, %32, %cst_16 {dimension_numbers = #tpu.dot_dimension_numbers<[1], [0], [0], [1], [0, 0, 1, 1], [], []>} : vector<8x32xbf16>, vector<32x32xbf16>, vector<8x32xf32> -> vector<8x32xf32>
    %c0_17 = arith.constant 0 : index
    %c0_18 = arith.constant 0 : index
    %c0_19 = arith.constant 0 : index
    %34 = vector.load %arg6[%c0_17, %c0_18, %c0_19] : memref<2x1x32xf32, #tpu.memory_space<vmem>>, vector<1x1x32xf32>
    %35 = vector.shape_cast %34 : vector<1x1x32xf32> to vector<1x32xf32>
    %36 = vector.broadcast %35 : vector<1x32xf32> to vector<8x32xf32>
    %37 = arith.addf %33, %36 : vector<8x32xf32>
    %38 = arith.truncf %37 : vector<8x32xf32> to vector<8x32xbf16>
    %c0_20 = arith.constant 0 : index
    %c0_21 = arith.constant 0 : index
    %c0_22 = arith.constant 0 : index
    %39 = vector.load %arg7[%c0_20, %c0_21, %c0_22] : memref<2x32x32xbf16, #tpu.memory_space<vmem>>, vector<1x32x32xbf16>
    %40 = vector.shape_cast %39 : vector<1x32x32xbf16> to vector<32x32xbf16>
    %cst_23 = arith.constant dense<0.000000e+00> : vector<8x32xf32>
    %41 = tpu.matmul %30, %40, %cst_23 {dimension_numbers = #tpu.dot_dimension_numbers<[1], [0], [0], [1], [0, 0, 1, 1], [], []>} : vector<8x32xbf16>, vector<32x32xbf16>, vector<8x32xf32> -> vector<8x32xf32>
    %c0_24 = arith.constant 0 : index
    %c0_25 = arith.constant 0 : index
    %c0_26 = arith.constant 0 : index
    %42 = vector.load %arg8[%c0_24, %c0_25, %c0_26] : memref<2x1x32xf32, #tpu.memory_space<vmem>>, vector<1x1x32xf32>
    %43 = vector.shape_cast %42 : vector<1x1x32xf32> to vector<1x32xf32>
    %44 = vector.broadcast %43 : vector<1x32xf32> to vector<8x32xf32>
    %45 = arith.addf %41, %44 : vector<8x32xf32>
    %46 = arith.truncf %45 : vector<8x32xf32> to vector<8x32xbf16>
    %c0_27 = arith.constant 0 : index
    %c0_28 = arith.constant 0 : index
    %c0_29 = arith.constant 0 : index
    %47 = vector.load %arg9[%c0_27, %c0_28, %c0_29] : memref<2x32x32xbf16, #tpu.memory_space<vmem>>, vector<1x32x32xbf16>
    %48 = vector.shape_cast %47 : vector<1x32x32xbf16> to vector<32x32xbf16>
    %cst_30 = arith.constant dense<0.000000e+00> : vector<8x32xf32>
    %49 = tpu.matmul %30, %48, %cst_30 {dimension_numbers = #tpu.dot_dimension_numbers<[1], [0], [0], [1], [0, 0, 1, 1], [], []>} : vector<8x32xbf16>, vector<32x32xbf16>, vector<8x32xf32> -> vector<8x32xf32>
    %c0_31 = arith.constant 0 : index
    %c0_32 = arith.constant 0 : index
    %c0_33 = arith.constant 0 : index
    %50 = vector.load %arg10[%c0_31, %c0_32, %c0_33] : memref<2x1x32xf32, #tpu.memory_space<vmem>>, vector<1x1x32xf32>
    %51 = vector.shape_cast %50 : vector<1x1x32xf32> to vector<1x32xf32>
    %52 = vector.broadcast %51 : vector<1x32xf32> to vector<8x32xf32>
    %53 = arith.addf %49, %52 : vector<8x32xf32>
    %54 = arith.truncf %53 : vector<8x32xf32> to vector<8x32xbf16>
    %55 = vector.extract_strided_slice %38 {offsets = [0, 0], sizes = [8, 8], strides = [1, 1]} : vector<8x32xbf16> to vector<8x8xbf16>
    %56 = vector.extract_strided_slice %46 {offsets = [0, 0], sizes = [8, 8], strides = [1, 1]} : vector<8x32xbf16> to vector<8x8xbf16>
    %57 = tpu.transpose %56, [1, 0] : vector<8x8xbf16> -> vector<8x8xbf16>
    %cst_34 = arith.constant dense<0.000000e+00> : vector<8x8xf32>
    %58 = tpu.matmul %55, %57, %cst_34 {dimension_numbers = #tpu.dot_dimension_numbers<[1], [0], [0], [1], [0, 0, 1, 1], [], []>} : vector<8x8xbf16>, vector<8x8xbf16>, vector<8x8xf32> -> vector<8x8xf32>
    %cst_35 = arith.constant 0.353553385 : f32
    %59 = vector.broadcast %cst_35 : f32 to vector<8x8xf32>
    %60 = arith.mulf %58, %59 : vector<8x8xf32>
    %61 = arith.addf %60, %29 : vector<8x8xf32>
    %cst_36 = arith.constant dense<0xFF800000> : vector<8xf32>
    %62 = vector.multi_reduction <maximumf>, %61, %cst_36 [1] : vector<8x8xf32> to vector<8xf32>
    %63 = vector.shape_cast %62 : vector<8xf32> to vector<8x1xf32>
    %64 = vector.broadcast %63 : vector<8x1xf32> to vector<8x8xf32>
    %65 = arith.subf %61, %64 : vector<8x8xf32>
    %66 = math.exp %65 : vector<8x8xf32>
    %cst_37 = arith.constant dense<0.000000e+00> : vector<8xf32>
    %67 = vector.multi_reduction <add>, %66, %cst_37 [1] : vector<8x8xf32> to vector<8xf32>
    %68 = vector.shape_cast %67 : vector<8xf32> to vector<8x1xf32>
    %69 = tpu.reciprocal %68 {approx = true} : vector<8x1xf32> -> vector<8x1xf32>
    %70 = vector.broadcast %69 : vector<8x1xf32> to vector<8x8xf32>
    %71 = arith.mulf %66, %70 : vector<8x8xf32>
    %72 = arith.truncf %71 : vector<8x8xf32> to vector<8x8xbf16>
    %73 = vector.extract_strided_slice %54 {offsets = [0, 0], sizes = [8, 8], strides = [1, 1]} : vector<8x32xbf16> to vector<8x8xbf16>
    %cst_38 = arith.constant dense<0.000000e+00> : vector<8x8xf32>
    %74 = tpu.matmul %72, %73, %cst_38 {dimension_numbers = #tpu.dot_dimension_numbers<[1], [0], [0], [1], [0, 0, 1, 1], [], []>} : vector<8x8xbf16>, vector<8x8xbf16>, vector<8x8xf32> -> vector<8x8xf32>
    %75 = vector.extract_strided_slice %38 {offsets = [0, 8], sizes = [8, 8], strides = [1, 1]} : vector<8x32xbf16> to vector<8x8xbf16>
    %76 = vector.extract_strided_slice %46 {offsets = [0, 8], sizes = [8, 8], strides = [1, 1]} : vector<8x32xbf16> to vector<8x8xbf16>
    %77 = tpu.transpose %76, [1, 0] : vector<8x8xbf16> -> vector<8x8xbf16>
    %cst_39 = arith.constant dense<0.000000e+00> : vector<8x8xf32>
    %78 = tpu.matmul %75, %77, %cst_39 {dimension_numbers = #tpu.dot_dimension_numbers<[1], [0], [0], [1], [0, 0, 1, 1], [], []>} : vector<8x8xbf16>, vector<8x8xbf16>, vector<8x8xf32> -> vector<8x8xf32>
    %cst_40 = arith.constant 0.353553385 : f32
    %79 = vector.broadcast %cst_40 : f32 to vector<8x8xf32>
    %80 = arith.mulf %78, %79 : vector<8x8xf32>
    %81 = arith.addf %80, %29 : vector<8x8xf32>
    %cst_41 = arith.constant dense<0xFF800000> : vector<8xf32>
    %82 = vector.multi_reduction <maximumf>, %81, %cst_41 [1] : vector<8x8xf32> to vector<8xf32>
    %83 = vector.shape_cast %82 : vector<8xf32> to vector<8x1xf32>
    %84 = vector.broadcast %83 : vector<8x1xf32> to vector<8x8xf32>
    %85 = arith.subf %81, %84 : vector<8x8xf32>
    %86 = math.exp %85 : vector<8x8xf32>
    %cst_42 = arith.constant dense<0.000000e+00> : vector<8xf32>
    %87 = vector.multi_reduction <add>, %86, %cst_42 [1] : vector<8x8xf32> to vector<8xf32>
    %88 = vector.shape_cast %87 : vector<8xf32> to vector<8x1xf32>
    %89 = tpu.reciprocal %88 {approx = true} : vector<8x1xf32> -> vector<8x1xf32>
    %90 = vector.broadcast %89 : vector<8x1xf32> to vector<8x8xf32>
    %91 = arith.mulf %86, %90 : vector<8x8xf32>
    %92 = arith.truncf %91 : vector<8x8xf32> to vector<8x8xbf16>
    %93 = vector.extract_strided_slice %54 {offsets = [0, 8], sizes = [8, 8], strides = [1, 1]} : vector<8x32xbf16> to vector<8x8xbf16>
    %cst_43 = arith.constant dense<0.000000e+00> : vector<8x8xf32>
    %94 = tpu.matmul %92, %93, %cst_43 {dimension_numbers = #tpu.dot_dimension_numbers<[1], [0], [0], [1], [0, 0, 1, 1], [], []>} : vector<8x8xbf16>, vector<8x8xbf16>, vector<8x8xf32> -> vector<8x8xf32>
    %95 = vector.extract_strided_slice %38 {offsets = [0, 16], sizes = [8, 8], strides = [1, 1]} : vector<8x32xbf16> to vector<8x8xbf16>
    %96 = vector.extract_strided_slice %46 {offsets = [0, 16], sizes = [8, 8], strides = [1, 1]} : vector<8x32xbf16> to vector<8x8xbf16>
    %97 = tpu.transpose %96, [1, 0] : vector<8x8xbf16> -> vector<8x8xbf16>
    %cst_44 = arith.constant dense<0.000000e+00> : vector<8x8xf32>
    %98 = tpu.matmul %95, %97, %cst_44 {dimension_numbers = #tpu.dot_dimension_numbers<[1], [0], [0], [1], [0, 0, 1, 1], [], []>} : vector<8x8xbf16>, vector<8x8xbf16>, vector<8x8xf32> -> vector<8x8xf32>
    %cst_45 = arith.constant 0.353553385 : f32
    %99 = vector.broadcast %cst_45 : f32 to vector<8x8xf32>
    %100 = arith.mulf %98, %99 : vector<8x8xf32>
    %101 = arith.addf %100, %29 : vector<8x8xf32>
    %cst_46 = arith.constant dense<0xFF800000> : vector<8xf32>
    %102 = vector.multi_reduction <maximumf>, %101, %cst_46 [1] : vector<8x8xf32> to vector<8xf32>
    %103 = vector.shape_cast %102 : vector<8xf32> to vector<8x1xf32>
    %104 = vector.broadcast %103 : vector<8x1xf32> to vector<8x8xf32>
    %105 = arith.subf %101, %104 : vector<8x8xf32>
    %106 = math.exp %105 : vector<8x8xf32>
    %cst_47 = arith.constant dense<0.000000e+00> : vector<8xf32>
    %107 = vector.multi_reduction <add>, %106, %cst_47 [1] : vector<8x8xf32> to vector<8xf32>
    %108 = vector.shape_cast %107 : vector<8xf32> to vector<8x1xf32>
    %109 = tpu.reciprocal %108 {approx = true} : vector<8x1xf32> -> vector<8x1xf32>
    %110 = vector.broadcast %109 : vector<8x1xf32> to vector<8x8xf32>
    %111 = arith.mulf %106, %110 : vector<8x8xf32>
    %112 = arith.truncf %111 : vector<8x8xf32> to vector<8x8xbf16>
    %113 = vector.extract_strided_slice %54 {offsets = [0, 16], sizes = [8, 8], strides = [1, 1]} : vector<8x32xbf16> to vector<8x8xbf16>
    %cst_48 = arith.constant dense<0.000000e+00> : vector<8x8xf32>
    %114 = tpu.matmul %112, %113, %cst_48 {dimension_numbers = #tpu.dot_dimension_numbers<[1], [0], [0], [1], [0, 0, 1, 1], [], []>} : vector<8x8xbf16>, vector<8x8xbf16>, vector<8x8xf32> -> vector<8x8xf32>
    %115 = vector.extract_strided_slice %38 {offsets = [0, 24], sizes = [8, 8], strides = [1, 1]} : vector<8x32xbf16> to vector<8x8xbf16>
    %116 = vector.extract_strided_slice %46 {offsets = [0, 24], sizes = [8, 8], strides = [1, 1]} : vector<8x32xbf16> to vector<8x8xbf16>
    %117 = tpu.transpose %116, [1, 0] : vector<8x8xbf16> -> vector<8x8xbf16>
    %cst_49 = arith.constant dense<0.000000e+00> : vector<8x8xf32>
    %118 = tpu.matmul %115, %117, %cst_49 {dimension_numbers = #tpu.dot_dimension_numbers<[1], [0], [0], [1], [0, 0, 1, 1], [], []>} : vector<8x8xbf16>, vector<8x8xbf16>, vector<8x8xf32> -> vector<8x8xf32>
    %cst_50 = arith.constant 0.353553385 : f32
    %119 = vector.broadcast %cst_50 : f32 to vector<8x8xf32>
    %120 = arith.mulf %118, %119 : vector<8x8xf32>
    %121 = arith.addf %120, %29 : vector<8x8xf32>
    %cst_51 = arith.constant dense<0xFF800000> : vector<8xf32>
    %122 = vector.multi_reduction <maximumf>, %121, %cst_51 [1] : vector<8x8xf32> to vector<8xf32>
    %123 = vector.shape_cast %122 : vector<8xf32> to vector<8x1xf32>
    %124 = vector.broadcast %123 : vector<8x1xf32> to vector<8x8xf32>
    %125 = arith.subf %121, %124 : vector<8x8xf32>
    %126 = math.exp %125 : vector<8x8xf32>
    %cst_52 = arith.constant dense<0.000000e+00> : vector<8xf32>
    %127 = vector.multi_reduction <add>, %126, %cst_52 [1] : vector<8x8xf32> to vector<8xf32>
    %128 = vector.shape_cast %127 : vector<8xf32> to vector<8x1xf32>
    %129 = tpu.reciprocal %128 {approx = true} : vector<8x1xf32> -> vector<8x1xf32>
    %130 = vector.broadcast %129 : vector<8x1xf32> to vector<8x8xf32>
    %131 = arith.mulf %126, %130 : vector<8x8xf32>
    %132 = arith.truncf %131 : vector<8x8xf32> to vector<8x8xbf16>
    %133 = vector.extract_strided_slice %54 {offsets = [0, 24], sizes = [8, 8], strides = [1, 1]} : vector<8x32xbf16> to vector<8x8xbf16>
    %cst_53 = arith.constant dense<0.000000e+00> : vector<8x8xf32>
    %134 = tpu.matmul %132, %133, %cst_53 {dimension_numbers = #tpu.dot_dimension_numbers<[1], [0], [0], [1], [0, 0, 1, 1], [], []>} : vector<8x8xbf16>, vector<8x8xbf16>, vector<8x8xf32> -> vector<8x8xf32>
    %135 = tpu.concatenate %74, %94, %114, %134 in 1 : vector<8x8xf32>, vector<8x8xf32>, vector<8x8xf32>, vector<8x8xf32> -> vector<8x32xf32>
    %136 = arith.truncf %135 : vector<8x32xf32> to vector<8x32xbf16>
    %c0_54 = arith.constant 0 : index
    %c0_55 = arith.constant 0 : index
    %c0_56 = arith.constant 0 : index
    %137 = vector.load %arg11[%c0_54, %c0_55, %c0_56] : memref<2x32x32xbf16, #tpu.memory_space<vmem>>, vector<1x32x32xbf16>
    %138 = vector.shape_cast %137 : vector<1x32x32xbf16> to vector<32x32xbf16>
    %cst_57 = arith.constant dense<0.000000e+00> : vector<8x32xf32>
    %139 = tpu.matmul %136, %138, %cst_57 {dimension_numbers = #tpu.dot_dimension_numbers<[1], [0], [0], [1], [0, 0, 1, 1], [], []>} : vector<8x32xbf16>, vector<32x32xbf16>, vector<8x32xf32> -> vector<8x32xf32>
    %c0_58 = arith.constant 0 : index
    %c0_59 = arith.constant 0 : index
    %c0_60 = arith.constant 0 : index
    %140 = vector.load %arg12[%c0_58, %c0_59, %c0_60] : memref<2x1x32xf32, #tpu.memory_space<vmem>>, vector<1x1x32xf32>
    %141 = vector.shape_cast %140 : vector<1x1x32xf32> to vector<1x32xf32>
    %142 = vector.broadcast %141 : vector<1x32xf32> to vector<8x32xf32>
    %143 = arith.addf %139, %142 : vector<8x32xf32>
    %144 = arith.addf %25, %143 : vector<8x32xf32>
    %c0_61 = arith.constant 0 : index
    %c0_62 = arith.constant 0 : index
    %c0_63 = arith.constant 0 : index
    %145 = vector.load %arg13[%c0_61, %c0_62, %c0_63] : memref<2x1x32xf32, #tpu.memory_space<vmem>>, vector<1x1x32xf32>
    %146 = vector.shape_cast %145 : vector<1x1x32xf32> to vector<1x32xf32>
    %c0_64 = arith.constant 0 : index
    %c0_65 = arith.constant 0 : index
    %c0_66 = arith.constant 0 : index
    %147 = vector.load %arg14[%c0_64, %c0_65, %c0_66] : memref<2x1x32xf32, #tpu.memory_space<vmem>>, vector<1x1x32xf32>
    %148 = vector.shape_cast %147 : vector<1x1x32xf32> to vector<1x32xf32>
    %cst_67 = arith.constant dense<0.000000e+00> : vector<8xf32>
    %149 = vector.multi_reduction <add>, %144, %cst_67 [1] : vector<8x32xf32> to vector<8xf32>
    %150 = vector.shape_cast %149 : vector<8xf32> to vector<8x1xf32>
    %cst_68 = arith.constant 3.200000e+01 : f32
    %151 = vector.broadcast %cst_68 : f32 to vector<8x1xf32>
    %152 = arith.divf %150, %151 : vector<8x1xf32>
    %153 = vector.broadcast %152 : vector<8x1xf32> to vector<8x32xf32>
    %154 = arith.subf %144, %153 : vector<8x32xf32>
    %155 = arith.mulf %154, %154 : vector<8x32xf32>
    %cst_69 = arith.constant dense<0.000000e+00> : vector<8xf32>
    %156 = vector.multi_reduction <add>, %155, %cst_69 [1] : vector<8x32xf32> to vector<8xf32>
    %157 = vector.shape_cast %156 : vector<8xf32> to vector<8x1xf32>
    %cst_70 = arith.constant 3.200000e+01 : f32
    %158 = vector.broadcast %cst_70 : f32 to vector<8x1xf32>
    %159 = arith.divf %157, %158 : vector<8x1xf32>
    %160 = vector.broadcast %152 : vector<8x1xf32> to vector<8x32xf32>
    %161 = arith.subf %144, %160 : vector<8x32xf32>
    %cst_71 = arith.constant 9.99999996E-13 : f32
    %162 = vector.broadcast %cst_71 : f32 to vector<8x1xf32>
    %163 = arith.addf %159, %162 : vector<8x1xf32>
    %164 = math.rsqrt %163 : vector<8x1xf32>
    %165 = vector.broadcast %164 : vector<8x1xf32> to vector<8x32xf32>
    %166 = arith.mulf %161, %165 : vector<8x32xf32>
    %167 = vector.broadcast %146 : vector<1x32xf32> to vector<8x32xf32>
    %168 = arith.mulf %166, %167 : vector<8x32xf32>
    %169 = vector.broadcast %148 : vector<1x32xf32> to vector<8x32xf32>
    %170 = arith.addf %168, %169 : vector<8x32xf32>
    %171 = arith.truncf %170 : vector<8x32xf32> to vector<8x32xbf16>
    %c0_72 = arith.constant 0 : index
    %c0_73 = arith.constant 0 : index
    %c0_74 = arith.constant 0 : index
    %172 = vector.load %arg15[%c0_72, %c0_73, %c0_74] : memref<2x32x64xbf16, #tpu.memory_space<vmem>>, vector<1x32x64xbf16>
    %173 = vector.shape_cast %172 : vector<1x32x64xbf16> to vector<32x64xbf16>
    %cst_75 = arith.constant dense<0.000000e+00> : vector<8x64xf32>
    %174 = tpu.matmul %171, %173, %cst_75 {dimension_numbers = #tpu.dot_dimension_numbers<[1], [0], [0], [1], [0, 0, 1, 1], [], []>} : vector<8x32xbf16>, vector<32x64xbf16>, vector<8x64xf32> -> vector<8x64xf32>
    %c0_76 = arith.constant 0 : index
    %c0_77 = arith.constant 0 : index
    %c0_78 = arith.constant 0 : index
    %175 = vector.load %arg16[%c0_76, %c0_77, %c0_78] : memref<2x1x64xf32, #tpu.memory_space<vmem>>, vector<1x1x64xf32>
    %176 = vector.shape_cast %175 : vector<1x1x64xf32> to vector<1x64xf32>
    %177 = vector.broadcast %176 : vector<1x64xf32> to vector<8x64xf32>
    %178 = arith.addf %174, %177 : vector<8x64xf32>
    %179 = arith.mulf %178, %178 : vector<8x64xf32>
    %180 = arith.mulf %178, %179 : vector<8x64xf32>
    %cst_79 = arith.constant 4.471500e-02 : f32
    %181 = vector.broadcast %cst_79 : f32 to vector<8x64xf32>
    %182 = arith.mulf %181, %180 : vector<8x64xf32>
    %183 = arith.addf %178, %182 : vector<8x64xf32>
    %cst_80 = arith.constant 0.797884583 : f32
    %184 = vector.broadcast %cst_80 : f32 to vector<8x64xf32>
    %185 = arith.mulf %184, %183 : vector<8x64xf32>
    %186 = math.tanh %185 : vector<8x64xf32>
    %cst_81 = arith.constant 1.000000e+00 : f32
    %187 = vector.broadcast %cst_81 : f32 to vector<8x64xf32>
    %188 = arith.addf %187, %186 : vector<8x64xf32>
    %cst_82 = arith.constant 5.000000e-01 : f32
    %189 = vector.broadcast %cst_82 : f32 to vector<8x64xf32>
    %190 = arith.mulf %189, %188 : vector<8x64xf32>
    %191 = arith.mulf %178, %190 : vector<8x64xf32>
    %192 = arith.truncf %191 : vector<8x64xf32> to vector<8x64xbf16>
    %c0_83 = arith.constant 0 : index
    %c0_84 = arith.constant 0 : index
    %c0_85 = arith.constant 0 : index
    %193 = vector.load %arg17[%c0_83, %c0_84, %c0_85] : memref<2x64x32xbf16, #tpu.memory_space<vmem>>, vector<1x64x32xbf16>
    %194 = vector.shape_cast %193 : vector<1x64x32xbf16> to vector<64x32xbf16>
    %cst_86 = arith.constant dense<0.000000e+00> : vector<8x32xf32>
    %195 = tpu.matmul %192, %194, %cst_86 {dimension_numbers = #tpu.dot_dimension_numbers<[1], [0], [0], [1], [0, 0, 1, 1], [], []>} : vector<8x64xbf16>, vector<64x32xbf16>, vector<8x32xf32> -> vector<8x32xf32>
    %c0_87 = arith.constant 0 : index
    %c0_88 = arith.constant 0 : index
    %c0_89 = arith.constant 0 : index
    %196 = vector.load %arg18[%c0_87, %c0_88, %c0_89] : memref<2x1x32xf32, #tpu.memory_space<vmem>>, vector<1x1x32xf32>
    %197 = vector.shape_cast %196 : vector<1x1x32xf32> to vector<1x32xf32>
    %198 = vector.broadcast %197 : vector<1x32xf32> to vector<8x32xf32>
    %199 = arith.addf %195, %198 : vector<8x32xf32>
    %200 = arith.addf %170, %199 : vector<8x32xf32>
    %c0_90 = arith.constant 0 : index
    %c0_91 = arith.constant 0 : index
    %c0_92 = arith.constant 0 : index
    %201 = vector.load %arg19[%c0_90, %c0_91, %c0_92] : memref<2x1x32xf32, #tpu.memory_space<vmem>>, vector<1x1x32xf32>
    %202 = vector.shape_cast %201 : vector<1x1x32xf32> to vector<1x32xf32>
    %c0_93 = arith.constant 0 : index
    %c0_94 = arith.constant 0 : index
    %c0_95 = arith.constant 0 : index
    %203 = vector.load %arg20[%c0_93, %c0_94, %c0_95] : memref<2x1x32xf32, #tpu.memory_space<vmem>>, vector<1x1x32xf32>
    %204 = vector.shape_cast %203 : vector<1x1x32xf32> to vector<1x32xf32>
    %cst_96 = arith.constant dense<0.000000e+00> : vector<8xf32>
    %205 = vector.multi_reduction <add>, %200, %cst_96 [1] : vector<8x32xf32> to vector<8xf32>
    %206 = vector.shape_cast %205 : vector<8xf32> to vector<8x1xf32>
    %cst_97 = arith.constant 3.200000e+01 : f32
    %207 = vector.broadcast %cst_97 : f32 to vector<8x1xf32>
    %208 = arith.divf %206, %207 : vector<8x1xf32>
    %209 = vector.broadcast %208 : vector<8x1xf32> to vector<8x32xf32>
    %210 = arith.subf %200, %209 : vector<8x32xf32>
    %211 = arith.mulf %210, %210 : vector<8x32xf32>
    %cst_98 = arith.constant dense<0.000000e+00> : vector<8xf32>
    %212 = vector.multi_reduction <add>, %211, %cst_98 [1] : vector<8x32xf32> to vector<8xf32>
    %213 = vector.shape_cast %212 : vector<8xf32> to vector<8x1xf32>
    %cst_99 = arith.constant 3.200000e+01 : f32
    %214 = vector.broadcast %cst_99 : f32 to vector<8x1xf32>
    %215 = arith.divf %213, %214 : vector<8x1xf32>
    %216 = vector.broadcast %208 : vector<8x1xf32> to vector<8x32xf32>
    %217 = arith.subf %200, %216 : vector<8x32xf32>
    %cst_100 = arith.constant 9.99999996E-13 : f32
    %218 = vector.broadcast %cst_100 : f32 to vector<8x1xf32>
    %219 = arith.addf %215, %218 : vector<8x1xf32>
    %220 = math.rsqrt %219 : vector<8x1xf32>
    %221 = vector.broadcast %220 : vector<8x1xf32> to vector<8x32xf32>
    %222 = arith.mulf %217, %221 : vector<8x32xf32>
    %223 = vector.broadcast %202 : vector<1x32xf32> to vector<8x32xf32>
    %224 = arith.mulf %222, %223 : vector<8x32xf32>
    %225 = vector.broadcast %204 : vector<1x32xf32> to vector<8x32xf32>
    %226 = arith.addf %224, %225 : vector<8x32xf32>
    %227 = arith.truncf %226 : vector<8x32xf32> to vector<8x32xbf16>
    %c1 = arith.constant 1 : index
    %c0_101 = arith.constant 0 : index
    %c0_102 = arith.constant 0 : index
    %228 = vector.load %arg5[%c1, %c0_101, %c0_102] : memref<2x32x32xbf16, #tpu.memory_space<vmem>>, vector<1x32x32xbf16>
    %229 = vector.shape_cast %228 : vector<1x32x32xbf16> to vector<32x32xbf16>
    %cst_103 = arith.constant dense<0.000000e+00> : vector<8x32xf32>
    %230 = tpu.matmul %227, %229, %cst_103 {dimension_numbers = #tpu.dot_dimension_numbers<[1], [0], [0], [1], [0, 0, 1, 1], [], []>} : vector<8x32xbf16>, vector<32x32xbf16>, vector<8x32xf32> -> vector<8x32xf32>
    %c1_104 = arith.constant 1 : index
    %c0_105 = arith.constant 0 : index
    %c0_106 = arith.constant 0 : index
    %231 = vector.load %arg6[%c1_104, %c0_105, %c0_106] : memref<2x1x32xf32, #tpu.memory_space<vmem>>, vector<1x1x32xf32>
    %232 = vector.shape_cast %231 : vector<1x1x32xf32> to vector<1x32xf32>
    %233 = vector.broadcast %232 : vector<1x32xf32> to vector<8x32xf32>
    %234 = arith.addf %230, %233 : vector<8x32xf32>
    %235 = arith.truncf %234 : vector<8x32xf32> to vector<8x32xbf16>
    %c1_107 = arith.constant 1 : index
    %c0_108 = arith.constant 0 : index
    %c0_109 = arith.constant 0 : index
    %236 = vector.load %arg7[%c1_107, %c0_108, %c0_109] : memref<2x32x32xbf16, #tpu.memory_space<vmem>>, vector<1x32x32xbf16>
    %237 = vector.shape_cast %236 : vector<1x32x32xbf16> to vector<32x32xbf16>
    %cst_110 = arith.constant dense<0.000000e+00> : vector<8x32xf32>
    %238 = tpu.matmul %227, %237, %cst_110 {dimension_numbers = #tpu.dot_dimension_numbers<[1], [0], [0], [1], [0, 0, 1, 1], [], []>} : vector<8x32xbf16>, vector<32x32xbf16>, vector<8x32xf32> -> vector<8x32xf32>
    %c1_111 = arith.constant 1 : index
    %c0_112 = arith.constant 0 : index
    %c0_113 = arith.constant 0 : index
    %239 = vector.load %arg8[%c1_111, %c0_112, %c0_113] : memref<2x1x32xf32, #tpu.memory_space<vmem>>, vector<1x1x32xf32>
    %240 = vector.shape_cast %239 : vector<1x1x32xf32> to vector<1x32xf32>
    %241 = vector.broadcast %240 : vector<1x32xf32> to vector<8x32xf32>
    %242 = arith.addf %238, %241 : vector<8x32xf32>
    %243 = arith.truncf %242 : vector<8x32xf32> to vector<8x32xbf16>
    %c1_114 = arith.constant 1 : index
    %c0_115 = arith.constant 0 : index
    %c0_116 = arith.constant 0 : index
    %244 = vector.load %arg9[%c1_114, %c0_115, %c0_116] : memref<2x32x32xbf16, #tpu.memory_space<vmem>>, vector<1x32x32xbf16>
    %245 = vector.shape_cast %244 : vector<1x32x32xbf16> to vector<32x32xbf16>
    %cst_117 = arith.constant dense<0.000000e+00> : vector<8x32xf32>
    %246 = tpu.matmul %227, %245, %cst_117 {dimension_numbers = #tpu.dot_dimension_numbers<[1], [0], [0], [1], [0, 0, 1, 1], [], []>} : vector<8x32xbf16>, vector<32x32xbf16>, vector<8x32xf32> -> vector<8x32xf32>
    %c1_118 = arith.constant 1 : index
    %c0_119 = arith.constant 0 : index
    %c0_120 = arith.constant 0 : index
    %247 = vector.load %arg10[%c1_118, %c0_119, %c0_120] : memref<2x1x32xf32, #tpu.memory_space<vmem>>, vector<1x1x32xf32>
    %248 = vector.shape_cast %247 : vector<1x1x32xf32> to vector<1x32xf32>
    %249 = vector.broadcast %248 : vector<1x32xf32> to vector<8x32xf32>
    %250 = arith.addf %246, %249 : vector<8x32xf32>
    %251 = arith.truncf %250 : vector<8x32xf32> to vector<8x32xbf16>
    %252 = vector.extract_strided_slice %235 {offsets = [0, 0], sizes = [8, 8], strides = [1, 1]} : vector<8x32xbf16> to vector<8x8xbf16>
    %253 = vector.extract_strided_slice %243 {offsets = [0, 0], sizes = [8, 8], strides = [1, 1]} : vector<8x32xbf16> to vector<8x8xbf16>
    %254 = tpu.transpose %253, [1, 0] : vector<8x8xbf16> -> vector<8x8xbf16>
    %cst_121 = arith.constant dense<0.000000e+00> : vector<8x8xf32>
    %255 = tpu.matmul %252, %254, %cst_121 {dimension_numbers = #tpu.dot_dimension_numbers<[1], [0], [0], [1], [0, 0, 1, 1], [], []>} : vector<8x8xbf16>, vector<8x8xbf16>, vector<8x8xf32> -> vector<8x8xf32>
    %cst_122 = arith.constant 0.353553385 : f32
    %256 = vector.broadcast %cst_122 : f32 to vector<8x8xf32>
    %257 = arith.mulf %255, %256 : vector<8x8xf32>
    %258 = arith.addf %257, %29 : vector<8x8xf32>
    %cst_123 = arith.constant dense<0xFF800000> : vector<8xf32>
    %259 = vector.multi_reduction <maximumf>, %258, %cst_123 [1] : vector<8x8xf32> to vector<8xf32>
    %260 = vector.shape_cast %259 : vector<8xf32> to vector<8x1xf32>
    %261 = vector.broadcast %260 : vector<8x1xf32> to vector<8x8xf32>
    %262 = arith.subf %258, %261 : vector<8x8xf32>
    %263 = math.exp %262 : vector<8x8xf32>
    %cst_124 = arith.constant dense<0.000000e+00> : vector<8xf32>
    %264 = vector.multi_reduction <add>, %263, %cst_124 [1] : vector<8x8xf32> to vector<8xf32>
    %265 = vector.shape_cast %264 : vector<8xf32> to vector<8x1xf32>
    %266 = tpu.reciprocal %265 {approx = true} : vector<8x1xf32> -> vector<8x1xf32>
    %267 = vector.broadcast %266 : vector<8x1xf32> to vector<8x8xf32>
    %268 = arith.mulf %263, %267 : vector<8x8xf32>
    %269 = arith.truncf %268 : vector<8x8xf32> to vector<8x8xbf16>
    %270 = vector.extract_strided_slice %251 {offsets = [0, 0], sizes = [8, 8], strides = [1, 1]} : vector<8x32xbf16> to vector<8x8xbf16>
    %cst_125 = arith.constant dense<0.000000e+00> : vector<8x8xf32>
    %271 = tpu.matmul %269, %270, %cst_125 {dimension_numbers = #tpu.dot_dimension_numbers<[1], [0], [0], [1], [0, 0, 1, 1], [], []>} : vector<8x8xbf16>, vector<8x8xbf16>, vector<8x8xf32> -> vector<8x8xf32>
    %272 = vector.extract_strided_slice %235 {offsets = [0, 8], sizes = [8, 8], strides = [1, 1]} : vector<8x32xbf16> to vector<8x8xbf16>
    %273 = vector.extract_strided_slice %243 {offsets = [0, 8], sizes = [8, 8], strides = [1, 1]} : vector<8x32xbf16> to vector<8x8xbf16>
    %274 = tpu.transpose %273, [1, 0] : vector<8x8xbf16> -> vector<8x8xbf16>
    %cst_126 = arith.constant dense<0.000000e+00> : vector<8x8xf32>
    %275 = tpu.matmul %272, %274, %cst_126 {dimension_numbers = #tpu.dot_dimension_numbers<[1], [0], [0], [1], [0, 0, 1, 1], [], []>} : vector<8x8xbf16>, vector<8x8xbf16>, vector<8x8xf32> -> vector<8x8xf32>
    %cst_127 = arith.constant 0.353553385 : f32
    %276 = vector.broadcast %cst_127 : f32 to vector<8x8xf32>
    %277 = arith.mulf %275, %276 : vector<8x8xf32>
    %278 = arith.addf %277, %29 : vector<8x8xf32>
    %cst_128 = arith.constant dense<0xFF800000> : vector<8xf32>
    %279 = vector.multi_reduction <maximumf>, %278, %cst_128 [1] : vector<8x8xf32> to vector<8xf32>
    %280 = vector.shape_cast %279 : vector<8xf32> to vector<8x1xf32>
    %281 = vector.broadcast %280 : vector<8x1xf32> to vector<8x8xf32>
    %282 = arith.subf %278, %281 : vector<8x8xf32>
    %283 = math.exp %282 : vector<8x8xf32>
    %cst_129 = arith.constant dense<0.000000e+00> : vector<8xf32>
    %284 = vector.multi_reduction <add>, %283, %cst_129 [1] : vector<8x8xf32> to vector<8xf32>
    %285 = vector.shape_cast %284 : vector<8xf32> to vector<8x1xf32>
    %286 = tpu.reciprocal %285 {approx = true} : vector<8x1xf32> -> vector<8x1xf32>
    %287 = vector.broadcast %286 : vector<8x1xf32> to vector<8x8xf32>
    %288 = arith.mulf %283, %287 : vector<8x8xf32>
    %289 = arith.truncf %288 : vector<8x8xf32> to vector<8x8xbf16>
    %290 = vector.extract_strided_slice %251 {offsets = [0, 8], sizes = [8, 8], strides = [1, 1]} : vector<8x32xbf16> to vector<8x8xbf16>
    %cst_130 = arith.constant dense<0.000000e+00> : vector<8x8xf32>
    %291 = tpu.matmul %289, %290, %cst_130 {dimension_numbers = #tpu.dot_dimension_numbers<[1], [0], [0], [1], [0, 0, 1, 1], [], []>} : vector<8x8xbf16>, vector<8x8xbf16>, vector<8x8xf32> -> vector<8x8xf32>
    %292 = vector.extract_strided_slice %235 {offsets = [0, 16], sizes = [8, 8], strides = [1, 1]} : vector<8x32xbf16> to vector<8x8xbf16>
    %293 = vector.extract_strided_slice %243 {offsets = [0, 16], sizes = [8, 8], strides = [1, 1]} : vector<8x32xbf16> to vector<8x8xbf16>
    %294 = tpu.transpose %293, [1, 0] : vector<8x8xbf16> -> vector<8x8xbf16>
    %cst_131 = arith.constant dense<0.000000e+00> : vector<8x8xf32>
    %295 = tpu.matmul %292, %294, %cst_131 {dimension_numbers = #tpu.dot_dimension_numbers<[1], [0], [0], [1], [0, 0, 1, 1], [], []>} : vector<8x8xbf16>, vector<8x8xbf16>, vector<8x8xf32> -> vector<8x8xf32>
    %cst_132 = arith.constant 0.353553385 : f32
    %296 = vector.broadcast %cst_132 : f32 to vector<8x8xf32>
    %297 = arith.mulf %295, %296 : vector<8x8xf32>
    %298 = arith.addf %297, %29 : vector<8x8xf32>
    %cst_133 = arith.constant dense<0xFF800000> : vector<8xf32>
    %299 = vector.multi_reduction <maximumf>, %298, %cst_133 [1] : vector<8x8xf32> to vector<8xf32>
    %300 = vector.shape_cast %299 : vector<8xf32> to vector<8x1xf32>
    %301 = vector.broadcast %300 : vector<8x1xf32> to vector<8x8xf32>
    %302 = arith.subf %298, %301 : vector<8x8xf32>
    %303 = math.exp %302 : vector<8x8xf32>
    %cst_134 = arith.constant dense<0.000000e+00> : vector<8xf32>
    %304 = vector.multi_reduction <add>, %303, %cst_134 [1] : vector<8x8xf32> to vector<8xf32>
    %305 = vector.shape_cast %304 : vector<8xf32> to vector<8x1xf32>
    %306 = tpu.reciprocal %305 {approx = true} : vector<8x1xf32> -> vector<8x1xf32>
    %307 = vector.broadcast %306 : vector<8x1xf32> to vector<8x8xf32>
    %308 = arith.mulf %303, %307 : vector<8x8xf32>
    %309 = arith.truncf %308 : vector<8x8xf32> to vector<8x8xbf16>
    %310 = vector.extract_strided_slice %251 {offsets = [0, 16], sizes = [8, 8], strides = [1, 1]} : vector<8x32xbf16> to vector<8x8xbf16>
    %cst_135 = arith.constant dense<0.000000e+00> : vector<8x8xf32>
    %311 = tpu.matmul %309, %310, %cst_135 {dimension_numbers = #tpu.dot_dimension_numbers<[1], [0], [0], [1], [0, 0, 1, 1], [], []>} : vector<8x8xbf16>, vector<8x8xbf16>, vector<8x8xf32> -> vector<8x8xf32>
    %312 = vector.extract_strided_slice %235 {offsets = [0, 24], sizes = [8, 8], strides = [1, 1]} : vector<8x32xbf16> to vector<8x8xbf16>
    %313 = vector.extract_strided_slice %243 {offsets = [0, 24], sizes = [8, 8], strides = [1, 1]} : vector<8x32xbf16> to vector<8x8xbf16>
    %314 = tpu.transpose %313, [1, 0] : vector<8x8xbf16> -> vector<8x8xbf16>
    %cst_136 = arith.constant dense<0.000000e+00> : vector<8x8xf32>
    %315 = tpu.matmul %312, %314, %cst_136 {dimension_numbers = #tpu.dot_dimension_numbers<[1], [0], [0], [1], [0, 0, 1, 1], [], []>} : vector<8x8xbf16>, vector<8x8xbf16>, vector<8x8xf32> -> vector<8x8xf32>
    %cst_137 = arith.constant 0.353553385 : f32
    %316 = vector.broadcast %cst_137 : f32 to vector<8x8xf32>
    %317 = arith.mulf %315, %316 : vector<8x8xf32>
    %318 = arith.addf %317, %29 : vector<8x8xf32>
    %cst_138 = arith.constant dense<0xFF800000> : vector<8xf32>
    %319 = vector.multi_reduction <maximumf>, %318, %cst_138 [1] : vector<8x8xf32> to vector<8xf32>
    %320 = vector.shape_cast %319 : vector<8xf32> to vector<8x1xf32>
    %321 = vector.broadcast %320 : vector<8x1xf32> to vector<8x8xf32>
    %322 = arith.subf %318, %321 : vector<8x8xf32>
    %323 = math.exp %322 : vector<8x8xf32>
    %cst_139 = arith.constant dense<0.000000e+00> : vector<8xf32>
    %324 = vector.multi_reduction <add>, %323, %cst_139 [1] : vector<8x8xf32> to vector<8xf32>
    %325 = vector.shape_cast %324 : vector<8xf32> to vector<8x1xf32>
    %326 = tpu.reciprocal %325 {approx = true} : vector<8x1xf32> -> vector<8x1xf32>
    %327 = vector.broadcast %326 : vector<8x1xf32> to vector<8x8xf32>
    %328 = arith.mulf %323, %327 : vector<8x8xf32>
    %329 = arith.truncf %328 : vector<8x8xf32> to vector<8x8xbf16>
    %330 = vector.extract_strided_slice %251 {offsets = [0, 24], sizes = [8, 8], strides = [1, 1]} : vector<8x32xbf16> to vector<8x8xbf16>
    %cst_140 = arith.constant dense<0.000000e+00> : vector<8x8xf32>
    %331 = tpu.matmul %329, %330, %cst_140 {dimension_numbers = #tpu.dot_dimension_numbers<[1], [0], [0], [1], [0, 0, 1, 1], [], []>} : vector<8x8xbf16>, vector<8x8xbf16>, vector<8x8xf32> -> vector<8x8xf32>
    %332 = tpu.concatenate %271, %291, %311, %331 in 1 : vector<8x8xf32>, vector<8x8xf32>, vector<8x8xf32>, vector<8x8xf32> -> vector<8x32xf32>
    %333 = arith.truncf %332 : vector<8x32xf32> to vector<8x32xbf16>
    %c1_141 = arith.constant 1 : index
    %c0_142 = arith.constant 0 : index
    %c0_143 = arith.constant 0 : index
    %334 = vector.load %arg11[%c1_141, %c0_142, %c0_143] : memref<2x32x32xbf16, #tpu.memory_space<vmem>>, vector<1x32x32xbf16>
    %335 = vector.shape_cast %334 : vector<1x32x32xbf16> to vector<32x32xbf16>
    %cst_144 = arith.constant dense<0.000000e+00> : vector<8x32xf32>
    %336 = tpu.matmul %333, %335, %cst_144 {dimension_numbers = #tpu.dot_dimension_numbers<[1], [0], [0], [1], [0, 0, 1, 1], [], []>} : vector<8x32xbf16>, vector<32x32xbf16>, vector<8x32xf32> -> vector<8x32xf32>
    %c1_145 = arith.constant 1 : index
    %c0_146 = arith.constant 0 : index
    %c0_147 = arith.constant 0 : index
    %337 = vector.load %arg12[%c1_145, %c0_146, %c0_147] : memref<2x1x32xf32, #tpu.memory_space<vmem>>, vector<1x1x32xf32>
    %338 = vector.shape_cast %337 : vector<1x1x32xf32> to vector<1x32xf32>
    %339 = vector.broadcast %338 : vector<1x32xf32> to vector<8x32xf32>
    %340 = arith.addf %336, %339 : vector<8x32xf32>
    %341 = arith.addf %226, %340 : vector<8x32xf32>
    %c1_148 = arith.constant 1 : index
    %c0_149 = arith.constant 0 : index
    %c0_150 = arith.constant 0 : index
    %342 = vector.load %arg13[%c1_148, %c0_149, %c0_150] : memref<2x1x32xf32, #tpu.memory_space<vmem>>, vector<1x1x32xf32>
    %343 = vector.shape_cast %342 : vector<1x1x32xf32> to vector<1x32xf32>
    %c1_151 = arith.constant 1 : index
    %c0_152 = arith.constant 0 : index
    %c0_153 = arith.constant 0 : index
    %344 = vector.load %arg14[%c1_151, %c0_152, %c0_153] : memref<2x1x32xf32, #tpu.memory_space<vmem>>, vector<1x1x32xf32>
    %345 = vector.shape_cast %344 : vector<1x1x32xf32> to vector<1x32xf32>
    %cst_154 = arith.constant dense<0.000000e+00> : vector<8xf32>
    %346 = vector.multi_reduction <add>, %341, %cst_154 [1] : vector<8x32xf32> to vector<8xf32>
    %347 = vector.shape_cast %346 : vector<8xf32> to vector<8x1xf32>
    %cst_155 = arith.constant 3.200000e+01 : f32
    %348 = vector.broadcast %cst_155 : f32 to vector<8x1xf32>
    %349 = arith.divf %347, %348 : vector<8x1xf32>
    %350 = vector.broadcast %349 : vector<8x1xf32> to vector<8x32xf32>
    %351 = arith.subf %341, %350 : vector<8x32xf32>
    %352 = arith.mulf %351, %351 : vector<8x32xf32>
    %cst_156 = arith.constant dense<0.000000e+00> : vector<8xf32>
    %353 = vector.multi_reduction <add>, %352, %cst_156 [1] : vector<8x32xf32> to vector<8xf32>
    %354 = vector.shape_cast %353 : vector<8xf32> to vector<8x1xf32>
    %cst_157 = arith.constant 3.200000e+01 : f32
    %355 = vector.broadcast %cst_157 : f32 to vector<8x1xf32>
    %356 = arith.divf %354, %355 : vector<8x1xf32>
    %357 = vector.broadcast %349 : vector<8x1xf32> to vector<8x32xf32>
    %358 = arith.subf %341, %357 : vector<8x32xf32>
    %cst_158 = arith.constant 9.99999996E-13 : f32
    %359 = vector.broadcast %cst_158 : f32 to vector<8x1xf32>
    %360 = arith.addf %356, %359 : vector<8x1xf32>
    %361 = math.rsqrt %360 : vector<8x1xf32>
    %362 = vector.broadcast %361 : vector<8x1xf32> to vector<8x32xf32>
    %363 = arith.mulf %358, %362 : vector<8x32xf32>
    %364 = vector.broadcast %343 : vector<1x32xf32> to vector<8x32xf32>
    %365 = arith.mulf %363, %364 : vector<8x32xf32>
    %366 = vector.broadcast %345 : vector<1x32xf32> to vector<8x32xf32>
    %367 = arith.addf %365, %366 : vector<8x32xf32>
    %368 = arith.truncf %367 : vector<8x32xf32> to vector<8x32xbf16>
    %c1_159 = arith.constant 1 : index
    %c0_160 = arith.constant 0 : index
    %c0_161 = arith.constant 0 : index
    %369 = vector.load %arg15[%c1_159, %c0_160, %c0_161] : memref<2x32x64xbf16, #tpu.memory_space<vmem>>, vector<1x32x64xbf16>
    %370 = vector.shape_cast %369 : vector<1x32x64xbf16> to vector<32x64xbf16>
    %cst_162 = arith.constant dense<0.000000e+00> : vector<8x64xf32>
    %371 = tpu.matmul %368, %370, %cst_162 {dimension_numbers = #tpu.dot_dimension_numbers<[1], [0], [0], [1], [0, 0, 1, 1], [], []>} : vector<8x32xbf16>, vector<32x64xbf16>, vector<8x64xf32> -> vector<8x64xf32>
    %c1_163 = arith.constant 1 : index
    %c0_164 = arith.constant 0 : index
    %c0_165 = arith.constant 0 : index
    %372 = vector.load %arg16[%c1_163, %c0_164, %c0_165] : memref<2x1x64xf32, #tpu.memory_space<vmem>>, vector<1x1x64xf32>
    %373 = vector.shape_cast %372 : vector<1x1x64xf32> to vector<1x64xf32>
    %374 = vector.broadcast %373 : vector<1x64xf32> to vector<8x64xf32>
    %375 = arith.addf %371, %374 : vector<8x64xf32>
    %376 = arith.mulf %375, %375 : vector<8x64xf32>
    %377 = arith.mulf %375, %376 : vector<8x64xf32>
    %cst_166 = arith.constant 4.471500e-02 : f32
    %378 = vector.broadcast %cst_166 : f32 to vector<8x64xf32>
    %379 = arith.mulf %378, %377 : vector<8x64xf32>
    %380 = arith.addf %375, %379 : vector<8x64xf32>
    %cst_167 = arith.constant 0.797884583 : f32
    %381 = vector.broadcast %cst_167 : f32 to vector<8x64xf32>
    %382 = arith.mulf %381, %380 : vector<8x64xf32>
    %383 = math.tanh %382 : vector<8x64xf32>
    %cst_168 = arith.constant 1.000000e+00 : f32
    %384 = vector.broadcast %cst_168 : f32 to vector<8x64xf32>
    %385 = arith.addf %384, %383 : vector<8x64xf32>
    %cst_169 = arith.constant 5.000000e-01 : f32
    %386 = vector.broadcast %cst_169 : f32 to vector<8x64xf32>
    %387 = arith.mulf %386, %385 : vector<8x64xf32>
    %388 = arith.mulf %375, %387 : vector<8x64xf32>
    %389 = arith.truncf %388 : vector<8x64xf32> to vector<8x64xbf16>
    %c1_170 = arith.constant 1 : index
    %c0_171 = arith.constant 0 : index
    %c0_172 = arith.constant 0 : index
    %390 = vector.load %arg17[%c1_170, %c0_171, %c0_172] : memref<2x64x32xbf16, #tpu.memory_space<vmem>>, vector<1x64x32xbf16>
    %391 = vector.shape_cast %390 : vector<1x64x32xbf16> to vector<64x32xbf16>
    %cst_173 = arith.constant dense<0.000000e+00> : vector<8x32xf32>
    %392 = tpu.matmul %389, %391, %cst_173 {dimension_numbers = #tpu.dot_dimension_numbers<[1], [0], [0], [1], [0, 0, 1, 1], [], []>} : vector<8x64xbf16>, vector<64x32xbf16>, vector<8x32xf32> -> vector<8x32xf32>
    %c1_174 = arith.constant 1 : index
    %c0_175 = arith.constant 0 : index
    %c0_176 = arith.constant 0 : index
    %393 = vector.load %arg18[%c1_174, %c0_175, %c0_176] : memref<2x1x32xf32, #tpu.memory_space<vmem>>, vector<1x1x32xf32>
    %394 = vector.shape_cast %393 : vector<1x1x32xf32> to vector<1x32xf32>
    %395 = vector.broadcast %394 : vector<1x32xf32> to vector<8x32xf32>
    %396 = arith.addf %392, %395 : vector<8x32xf32>
    %397 = arith.addf %367, %396 : vector<8x32xf32>
    %c1_177 = arith.constant 1 : index
    %c0_178 = arith.constant 0 : index
    %c0_179 = arith.constant 0 : index
    %398 = vector.load %arg19[%c1_177, %c0_178, %c0_179] : memref<2x1x32xf32, #tpu.memory_space<vmem>>, vector<1x1x32xf32>
    %399 = vector.shape_cast %398 : vector<1x1x32xf32> to vector<1x32xf32>
    %c1_180 = arith.constant 1 : index
    %c0_181 = arith.constant 0 : index
    %c0_182 = arith.constant 0 : index
    %400 = vector.load %arg20[%c1_180, %c0_181, %c0_182] : memref<2x1x32xf32, #tpu.memory_space<vmem>>, vector<1x1x32xf32>
    %401 = vector.shape_cast %400 : vector<1x1x32xf32> to vector<1x32xf32>
    %cst_183 = arith.constant dense<0.000000e+00> : vector<8xf32>
    %402 = vector.multi_reduction <add>, %397, %cst_183 [1] : vector<8x32xf32> to vector<8xf32>
    %403 = vector.shape_cast %402 : vector<8xf32> to vector<8x1xf32>
    %cst_184 = arith.constant 3.200000e+01 : f32
    %404 = vector.broadcast %cst_184 : f32 to vector<8x1xf32>
    %405 = arith.divf %403, %404 : vector<8x1xf32>
    %406 = vector.broadcast %405 : vector<8x1xf32> to vector<8x32xf32>
    %407 = arith.subf %397, %406 : vector<8x32xf32>
    %408 = arith.mulf %407, %407 : vector<8x32xf32>
    %cst_185 = arith.constant dense<0.000000e+00> : vector<8xf32>
    %409 = vector.multi_reduction <add>, %408, %cst_185 [1] : vector<8x32xf32> to vector<8xf32>
    %410 = vector.shape_cast %409 : vector<8xf32> to vector<8x1xf32>
    %cst_186 = arith.constant 3.200000e+01 : f32
    %411 = vector.broadcast %cst_186 : f32 to vector<8x1xf32>
    %412 = arith.divf %410, %411 : vector<8x1xf32>
    %413 = vector.broadcast %405 : vector<8x1xf32> to vector<8x32xf32>
    %414 = arith.subf %397, %413 : vector<8x32xf32>
    %cst_187 = arith.constant 9.99999996E-13 : f32
    %415 = vector.broadcast %cst_187 : f32 to vector<8x1xf32>
    %416 = arith.addf %412, %415 : vector<8x1xf32>
    %417 = math.rsqrt %416 : vector<8x1xf32>
    %418 = vector.broadcast %417 : vector<8x1xf32> to vector<8x32xf32>
    %419 = arith.mulf %414, %418 : vector<8x32xf32>
    %420 = vector.broadcast %399 : vector<1x32xf32> to vector<8x32xf32>
    %421 = arith.mulf %419, %420 : vector<8x32xf32>
    %422 = vector.broadcast %401 : vector<1x32xf32> to vector<8x32xf32>
    %423 = arith.addf %421, %422 : vector<8x32xf32>
    %424 = vector.extract_strided_slice %423 {offsets = [0, 0], sizes = [1, 32], strides = [1, 1]} : vector<8x32xf32> to vector<1x32xf32>
    %425 = arith.truncf %424 : vector<1x32xf32> to vector<1x32xbf16>
    %c0_188 = arith.constant 0 : index
    %c0_189 = arith.constant 0 : index
    %426 = vector.load %arg21[%c0_188, %c0_189] : memref<32x32xbf16, #tpu.memory_space<vmem>>, vector<32x32xbf16>
    %cst_190 = arith.constant dense<0.000000e+00> : vector<1x32xf32>
    %427 = tpu.matmul %425, %426, %cst_190 {dimension_numbers = #tpu.dot_dimension_numbers<[1], [0], [0], [1], [0, 0, 1, 1], [], []>} : vector<1x32xbf16>, vector<32x32xbf16>, vector<1x32xf32> -> vector<1x32xf32>
    %c0_191 = arith.constant 0 : index
    %c0_192 = arith.constant 0 : index
    %428 = vector.load %arg22[%c0_191, %c0_192] : memref<1x32xf32, #tpu.memory_space<vmem>>, vector<1x32xf32>
    %429 = arith.addf %427, %428 : vector<1x32xf32>
    %430 = math.tanh %429 : vector<1x32xf32>
    %c0_193 = arith.constant 0 : index
    %c0_194 = arith.constant 0 : index
    %c0_195 = arith.constant 0 : index
    %431 = vector.load %arg23[%c0_193, %c0_194, %c0_195] : memref<1x1x32xf32, #tpu.memory_space<vmem>>, vector<1x1x32xf32>
    %432 = vector.shape_cast %431 : vector<1x1x32xf32> to vector<1x32xf32>
    %433 = vector.shape_cast %430 : vector<1x32xf32> to vector<1x1x32xf32>
    tpu.vector_store %arg23[%c0_193, %c0_194, %c0_195], %433 {strides = array<i32>} : memref<1x1x32xf32, #tpu.memory_space<vmem>>, vector<1x1x32xf32>,
    return
  }
  func.func @transform_0(%arg0: i32) -> (i32, i32, i32) {
    %c0_i32 = arith.constant 0 : i32
    %c0_i32_0 = arith.constant 0 : i32
    %c0_i32_1 = arith.constant 0 : i32
    return %arg0, %c0_i32, %c0_i32_0 : i32, i32, i32
  }
  func.func @transform_1(%arg0: i32) -> (i32, i32, i32) {
    %c0_i32 = arith.constant 0 : i32
    %c0_i32_0 = arith.constant 0 : i32
    %c0_i32_1 = arith.constant 0 : i32
    return %arg0, %c0_i32, %c0_i32_0 : i32, i32, i32
  }
  func.func @transform_2(%arg0: i32) -> (i32, i32) {
    %c0_i32 = arith.constant 0 : i32
    %c0_i32_0 = arith.constant 0 : i32
    %c0_i32_1 = arith.constant 0 : i32
    return %c0_i32, %c0_i32_0 : i32, i32
  }
  func.func @transform_3(%arg0: i32) -> (i32, i32) {
    %c0_i32 = arith.constant 0 : i32
    %c0_i32_0 = arith.constant 0 : i32
    %c0_i32_1 = arith.constant 0 : i32
    return %c0_i32, %c0_i32_0 : i32, i32
  }
  func.func @transform_4(%arg0: i32) -> (i32, i32, i32) {
    %c0_i32 = arith.constant 0 : i32
    %c0_i32_0 = arith.constant 0 : i32
    %c0_i32_1 = arith.constant 0 : i32
    %c0_i32_2 = arith.constant 0 : i32
    return %c0_i32, %c0_i32_0, %c0_i32_1 : i32, i32, i32
  }
  func.func @transform_5(%arg0: i32) -> (i32, i32, i32) {
    %c0_i32 = arith.constant 0 : i32
    %c0_i32_0 = arith.constant 0 : i32
    %c0_i32_1 = arith.constant 0 : i32
    %c0_i32_2 = arith.constant 0 : i32
    return %c0_i32, %c0_i32_0, %c0_i32_1 : i32, i32, i32
  }
  func.func @transform_6(%arg0: i32) -> (i32, i32, i32) {
    %c0_i32 = arith.constant 0 : i32
    %c0_i32_0 = arith.constant 0 : i32
    %c0_i32_1 = arith.constant 0 : i32
    %c0_i32_2 = arith.constant 0 : i32
    return %c0_i32, %c0_i32_0, %c0_i32_1 : i32, i32, i32
  }
  func.func @transform_7(%arg0: i32) -> (i32, i32, i32) {
    %c0_i32 = arith.constant 0 : i32
    %c0_i32_0 = arith.constant 0 : i32
    %c0_i32_1 = arith.constant 0 : i32
    %c0_i32_2 = arith.constant 0 : i32
    return %c0_i32, %c0_i32_0, %c0_i32_1 : i32, i32, i32
  }
  func.func @transform_8(%arg0: i32) -> (i32, i32, i32) {
    %c0_i32 = arith.constant 0 : i32
    %c0_i32_0 = arith.constant 0 : i32
    %c0_i32_1 = arith.constant 0 : i32
    %c0_i32_2 = arith.constant 0 : i32
    return %c0_i32, %c0_i32_0, %c0_i32_1 : i32, i32, i32
  }
  func.func @transform_9(%arg0: i32) -> (i32, i32, i32) {
    %c0_i32 = arith.constant 0 : i32
    %c0_i32_0 = arith.constant 0 : i32
    %c0_i32_1 = arith.constant 0 : i32
    %c0_i32_2 = arith.constant 0 : i32
    return %c0_i32, %c0_i32_0, %c0_i32_1 : i32, i32, i32
  }
  func.func @transform_10(%arg0: i32) -> (i32, i32, i32) {
    %c0_i32 = arith.constant 0 : i32
    %c0_i32_0 = arith.constant 0 : i32
    %c0_i32_1 = arith.constant 0 : i32
    %c0_i32_2 = arith.constant 0 : i32
    return %c0_i32, %c0_i32_0, %c0_i32_1 : i32, i32, i32
  }
  func.func @transform_11(%arg0: i32) -> (i32, i32, i32) {
    %c0_i32 = arith.constant 0 : i32
    %c0_i32_0 = arith.constant 0 : i32
    %c0_i32_1 = arith.constant 0 : i32
    %c0_i32_2 = arith.constant 0 : i32
    return %c0_i32, %c0_i32_0, %c0_i32_1 : i32, i32, i32
  }
  func.func @transform_12(%arg0: i32) -> (i32, i32, i32) {
    %c0_i32 = arith.constant 0 : i32
    %c0_i32_0 = arith.constant 0 : i32
    %c0_i32_1 = arith.constant 0 : i32
    %c0_i32_2 = arith.constant 0 : i32
    return %c0_i32, %c0_i32_0, %c0_i32_1 : i32, i32, i32
  }
  func.func @transform_13(%arg0: i32) -> (i32, i32, i32) {
    %c0_i32 = arith.constant 0 : i32
    %c0_i32_0 = arith.constant 0 : i32
    %c0_i32_1 = arith.constant 0 : i32
    %c0_i32_2 = arith.constant 0 : i32
    return %c0_i32, %c0_i32_0, %c0_i32_1 : i32, i32, i32
  }
  func.func @transform_14(%arg0: i32) -> (i32, i32, i32) {
    %c0_i32 = arith.constant 0 : i32
    %c0_i32_0 = arith.constant 0 : i32
    %c0_i32_1 = arith.constant 0 : i32
    %c0_i32_2 = arith.constant 0 : i32
    return %c0_i32, %c0_i32_0, %c0_i32_1 : i32, i32, i32
  }
  func.func @transform_15(%arg0: i32) -> (i32, i32, i32) {
    %c0_i32 = arith.constant 0 : i32
    %c0_i32_0 = arith.constant 0 : i32
    %c0_i32_1 = arith.constant 0 : i32
    %c0_i32_2 = arith.constant 0 : i32
    return %c0_i32, %c0_i32_0, %c0_i32_1 : i32, i32, i32
  }
  func.func @transform_16(%arg0: i32) -> (i32, i32, i32) {
    %c0_i32 = arith.constant 0 : i32
    %c0_i32_0 = arith.constant 0 : i32
    %c0_i32_1 = arith.constant 0 : i32
    %c0_i32_2 = arith.constant 0 : i32
    return %c0_i32, %c0_i32_0, %c0_i32_1 : i32, i32, i32
  }
  func.func @transform_17(%arg0: i32) -> (i32, i32, i32) {
    %c0_i32 = arith.constant 0 : i32
    %c0_i32_0 = arith.constant 0 : i32
    %c0_i32_1 = arith.constant 0 : i32
    %c0_i32_2 = arith.constant 0 : i32
    return %c0_i32, %c0_i32_0, %c0_i32_1 : i32, i32, i32
  }
  func.func @transform_18(%arg0: i32) -> (i32, i32, i32) {
    %c0_i32 = arith.constant 0 : i32
    %c0_i32_0 = arith.constant 0 : i32
    %c0_i32_1 = arith.constant 0 : i32
    %c0_i32_2 = arith.constant 0 : i32
    return %c0_i32, %c0_i32_0, %c0_i32_1 : i32, i32, i32
  }
  func.func @transform_19(%arg0: i32) -> (i32, i32, i32) {
    %c0_i32 = arith.constant 0 : i32
    %c0_i32_0 = arith.constant 0 : i32
    %c0_i32_1 = arith.constant 0 : i32
    %c0_i32_2 = arith.constant 0 : i32
    return %c0_i32, %c0_i32_0, %c0_i32_1 : i32, i32, i32
  }
  func.func @transform_20(%arg0: i32) -> (i32, i32) {
    %c0_i32 = arith.constant 0 : i32
    %c0_i32_0 = arith.constant 0 : i32
    %c0_i32_1 = arith.constant 0 : i32
    return %c0_i32, %c0_i32_0 : i32, i32
  }
  func.func @transform_21(%arg0: i32) -> (i32, i32) {
    %c0_i32 = arith.constant 0 : i32
    %c0_i32_0 = arith.constant 0 : i32
    %c0_i32_1 = arith.constant 0 : i32
    return %c0_i32, %c0_i32_0 : i32, i32
  }
  func.func @transform_22(%arg0: i32) -> (i32, i32, i32) {
    %c0_i32 = arith.constant 0 : i32
    %c0_i32_0 = arith.constant 0 : i32
    %c0_i32_1 = arith.constant 0 : i32
    return %arg0, %c0_i32, %c0_i32_0 : i32, i32, i32
  }
}

</mosaic_0001>

<bundles_post_ra>
// kernel: clinical_bert_encoder.1
= control target key start
LH: loop header
LB: loop body
LE: loop exit
PB: predicated region body
PF: predicated region fallthrough
CT: control target
= control target key end

     0   :  { %s4005_s0 = inlined_call_operand.vmem [shape: f32[2,8,32], index: 0, kind: input, shape index: {}]   ;;  %s4006_s1 = inlined_call_operand.vmem [shape: f32[2,1,8], index: 1, kind: input, shape index: {}]   ;;  %s4007_s2 = inlined_call_operand.vmem [shape: f32[1,32], index: 2, kind: input, shape index: {}]   ;;  %s4008_s3 = inlined_call_operand.vmem [shape: f32[1,32], index: 3, kind: input, shape index: {}]   ;;  %s4009_s4 = inlined_call_operand.vmem [shape: bf16[2,32,32], index: 4, kind: input, shape index: {}]   ;;  %s4010_s5 = inlined_call_operand.vmem [shape: f32[2,1,32], index: 5, kind: input, shape index: {}]   ;;  %s4011_s6 = inlined_call_operand.vmem [shape: bf16[2,32,32], index: 6, kind: input, shape index: {}]   ;;  %s4012_s7 = inlined_call_operand.vmem [shape: f32[2,1,32], index: 7, kind: input, shape index: {}]   ;;  %s4013_s8 = inlined_call_operand.vmem [shape: bf16[2,32,32], index: 8, kind: input, shape index: {}]   ;;  %s4014_s9 = inlined_call_operand.vmem [shape: f32[2,1,32], index: 9, kind: input, shape index: {}]   ;;  %s4015_s10 = inlined_call_operand.vmem [shape: bf16[2,32,32], index: 10, kind: input, shape index: {}]   ;;  %s4016_s11 = inlined_call_operand.vmem [shape: f32[2,1,32], index: 11, kind: input, shape index: {}]   ;;  %s4017_s12 = inlined_call_operand.vmem [shape: f32[2,1,32], index: 12, kind: input, shape index: {}]   ;;  %s4018_s13 = inlined_call_operand.vmem [shape: f32[2,1,32], index: 13, kind: input, shape index: {}]   ;;  %s4019_s14 = inlined_call_operand.vmem [shape: bf16[2,32,64], index: 14, kind: input, shape index: {}]   ;;  %s4020_s15 = inlined_call_operand.vmem [shape: f32[2,1,64], index: 15, kind: input, shape index: {}]   ;;  %s4021_s16 = inlined_call_operand.vmem [shape: bf16[2,64,32], index: 16, kind: input, shape index: {}]   ;;  %s4022_s17 = inlined_call_operand.vmem [shape: f32[2,1,32], index: 17, kind: input, shape index: {}]   ;;  %s4023_s18 = inlined_call_operand.vmem [shape: f32[2,1,32], index: 18, kind: input, shape index: {}]   ;;  %s4024_s19 = inlined_call_operand.vmem [shape: f32[2,1,32], index: 19, kind: input, shape index: {}]   ;;  %s4025_s20 = inlined_call_operand.vmem [shape: bf16[32,32], index: 20, kind: input, shape index: {}]   ;;  %s4026_s21 = inlined_call_operand.vmem [shape: f32[1,32], index: 21, kind: input, shape index: {}]   ;;  %s4027_s22 = inlined_call_operand.hbm [shape: f32[2,1,32], index: 22, kind: output, shape index: {}]  }
   0x1   :  { %4043 = sst [smem:[#allocation11_spill]] %s4005_s0 }
   0x2   :  { %4044 = sst [smem:[#allocation12_spill]] %s4006_s1 }
   0x3   :  { %4045 = sst [smem:[#allocation13_spill]] %s4007_s2 }
   0x4   :  { %4046 = sst [smem:[#allocation14_spill]] %s4008_s3 }
   0x5   :  { %4047 = sst [smem:[#allocation15_spill]] %s4009_s4 }
   0x6   :  { %4048 = sst [smem:[#allocation16_spill]] %s4010_s5 }
   0x7   :  { %4049 = sst [smem:[#allocation17_spill]] %s4011_s6 }
   0x8   :  { %4050 = sst [smem:[#allocation18_spill]] %s4012_s7 }
   0x9   :  { %4051 = sst [smem:[#allocation19_spill]] %s4013_s8 }
   0xa   :  { %4052 = sst [smem:[#allocation20_spill]] %s4027_s22 }
   0xb   :  { %27 = vsyncpa [#allocation3], 0 }
   0xc   :  { %29 = vsyncpa [#allocation3 + $0x1], 0  ;;  %s3502_s3 = smov 0   ;;  %s3504_s28 = smov 0  }
   0xd   :  { %s3506_s29 = smov 0   ;;  %s3508_s30 = smov 0  }
   0xe LB: > { %4053 = sst [smem:[#allocation5_spill]] %s3364_s3  ;;  %s3523_s4 = sadd.s32 4294967295, %s3376_s30   ;;  %s3376_s30 = sphi %s3508_s30, %s4079_s30   ;;  %s3372_s29 = sphi %s3506_s29, %s4081_s29   ;;  %s3368_s28 = sphi %s3504_s28, %s4083_s28   ;;  %s3364_s3 = sphi %s3502_s3, %s4082_s3  }
   0xf   : > { %4054 = sst [smem:[#allocation6_spill]] %s3372_s29  ;;  %s2778_s0 = sadd.s32 4294967294, %s3376_s30  }
  0x10   : > { %4055 = sst [smem:[#allocation7_spill]] %s3376_s30  ;;  %s3527_s23 = sadd.s32 1, %s3376_s30  }
  0x11   : > { %4056 = sst [smem:[#allocation8_spill]] %s3527_s23  ;;  %s514_s1 = sadd.s32 1, %s3372_s29 }
  0x12   : > { %s511_s5 = ssub.s32 %s3376_s30, %s3527_s23  ;;  %p524_p0 = scmp.ne.s32.totalorder %s3372_s29, %s3368_s28 }
  0x13   : > { %p512_p1 = scmp.eq.s32.totalorder %s511_s5, 0  ;;  %p525_p2 = scmp.eq.s32.totalorder %s3523_s4, 1 }
  0x14   : > { %p530_p3 = scmp.ne.s32.totalorder %s3368_s28, %s3364_s3  ;;  %p531_p4 = scmp.eq.s32.totalorder %s2778_s0, 1 }
  0x15   : > { %s3538_s24 = scalar_select %p512_p1, %s3372_s29, %s514_s1  }
  0x16   : > { %p3540_p5 = por %p525_p2, %p524_p0  ;;  %p3544_p6 = por %p531_p4, %p530_p3 }
  0x17   : > { %4057 = sst [smem:[#allocation9_spill]] %s3538_s24  ;;  %p2781_p7 = scmp.ge.s32.totalorder %s3376_s30, 1 }
  0x18   : > { %s4059_s25 = scalar_select %p3544_p6, 1, 0 }
  0x19   : > { %p622_p8 = scmp.lt.s32.totalorder %s3376_s30, 3 }
  0x1a   : > { %4060 = sst [smem:[#allocation10_spill]] %s4059_s25 }
  0x1b   : > { %p623_p9 = pnand %p2781_p7, %p622_p8 }
  0x1c   : > { %p685_p10 = scmp.lt.s32.totalorder (!%p623_p9), %s3523_s4, 1  ;;  %vm696_vm0 = vcmask (!%p623_p9), 261120   ;;  %s4061_s1 = sld [smem:[#allocation11_spill]] (!%p623_p9)  ;;  %v3378_v9 = vmov (!%p623_p9), 0.0   ;;  %vm3379_vm1 = vmmov (!%p623_p9), 0   ;;  %vm928_vm2 = vcmask (!%p623_p9), 64512  }
  0x1d   : > { %626 = sbr.rel (%p623_p9) target bundleno = 5721 (0x1659), region = 108  ;;  %s4062_s23 = sld [smem:[#allocation15_spill]] (!%p623_p9)  ;;  %2981 = vmatprep.subr.bf16.mxu0 (!%p623_p9), %v3378_v9  ;;  %2989 = vmatprep.subr.bf16.mxu1 (!%p623_p9), %v3378_v9  ;;  %v2794_v38 = vld [vmem:[%s4014_s9] ss:$0 sm:$0xff] (!%p623_p9)  ;;  %vm992_vm3 = vcmask (!%p623_p9), 1043456   ;;  %vm1388_vm4 = vcmask (!%p623_p9), 130048  }
  0x1e   : > { %s4063_s30 = sld [smem:[#allocation17_spill]] (!%p623_p9)  ;;  %2985 = vmatprep.mubr.msk.bf16.mxu0 (!%p623_p9), %vm3379_vm1, %v3378_v9  ;;  %2993 = vmatprep.mubr.msk.bf16.mxu1 (!%p623_p9), %vm3379_vm1, %v3378_v9  ;;  %s4067_s8 = sld [smem:[#allocation19_spill]] (!%p623_p9)  ;;  %vm1390_vm5 = vcmask (!%p623_p9), 195584   ;;  %vm1605_vm6 = vcmask (!%p623_p9), 523264   ;;  %vm2699_vm7 = vcmask (!%p623_p9), 253952  }
  0x1f   : > { %s4068_s7 = sld [smem:[#allocation18_spill]] (!%p623_p9)  ;;  %s4069_s25 = sld [smem:[#allocation16_spill]] (!%p623_p9) }
  0x20   : > { %s4040_s0 = smov (!%p623_p9), 8   ;;  %s4039_s3 = smov (!%p623_p9), 16  }
  0x21   : > { %s4073_s29 = smov (!%p623_p9), 16   ;;  %s4074_s27 = smov (!%p623_p9), 24  }
  0x23   : > { %v3236_v7 = vld [vmem:[%s4062_s23] sm:$0xff] (!%p623_p9)   ;;  %v3238_v10 = vld [vmem:[%s4062_s23 + $0x8] sm:$0xff] (!%p623_p9)  }
  0x24   : > { %s3552_s26 = scalar_select %p685_p10, %s3523_s4, 1  ;;  %v3237_v8 = vld [vmem:[%s4063_s30] sm:$0xff]   ;;  %2982 = vmatpush3.bf16.msra.mxu0 %v3236_v7  ;;  %v3241_v23 = vld [vmem:[%s4067_s8 + $0x8] sm:$0xff]  }
  0x25   : > { %s4064_s22 = smov %s4063_s30  ;;  %2990 = vmatpush3.bf16.msra.mxu1 %v3237_v8  ;;  %2983 = vmatprep.subr.bf16.mxu0 %v3378_v9  ;;  %s4065_s30 = sld [smem:[#allocation13_spill]]  ;;  %v3240_v21 = vld [vmem:[%s4067_s8] sm:$0xff]  }
  0x26   : > { %s2782_s2 = sshll.u32 %s3552_s26, 3  ;;  %v3239_v11 = vld [vmem:[%s4064_s22 + $0x8] sm:$0xff]   ;;  %2991 = vmatprep.subr.bf16.mxu1 %v3378_v9  ;;  %v2790_v24 = vld [vmem:[%s4068_s7] ss:$0 sm:$0xff] }
  0x27   : > { %s688_s5 = scalar_lea.vmem %s4061_s1, %s2782_s2  ;;  %v2786_v25 = vld [vmem:[%s4069_s25] ss:$0 sm:$0xff]  ;;  %s3381_s2 = smov 120  }
  0x28   : > { %v693_v0 = vld [vmem:[%s688_s5] sm:$0xff]  ;;  %2984 = vmatpush3.bf16.msra.mxu0 %v3238_v10  ;;  %s4066_s5 = sld [smem:[#allocation14_spill]]  ;;  %s4041_s1 = smov 104  }
  0x29   : > { %v697_v1 = vsel %vm696_vm0, %v693_v0, 0.0  ;;  %2992 = vmatpush3.bf16.msra.mxu1 %v3239_v11  ;;  %2997 = vmatprep.subr.bf16.mxu0 %v3378_v9 }
  0x2a   : > { %698 = vadd.xlane.f32.xlu0 %v697_v1  ;;  %3005 = vmatprep.subr.bf16.mxu1 %v3378_v9 }
  0x2b   : > { %v2783_v16 = vld [vmem:[%s4065_s30] ss:$0 sm:$0xff]  ;;  %s4070_s30 = sld [smem:[#allocation12_spill]] }
  0x2e   : > { %v2784_v18 = vld [vmem:[%s4066_s5] ss:$0 sm:$0xff]  ;;  %s3380_s5 = smov 112  }
  0x31   : > { %s691_s24 = scalar_lea.vmem %s4070_s30, %s3552_s26  ;;  %s4075_s26 = sld [smem:[#allocation20_spill]] }
  0x32   : > { %v3653_v56 = vld [vmem:[%s691_s24] ss:$0 sm:$0xff]  ;;  %s4038_s24 = smov 24  }
  0xb7   : > { %v699_v2 = vpop.xlane.xlu0 %698 }
  0xb8   : > { %v701_v3 = vmul.f32 0.03125, %v699_v2 }
  0xba   : > { %v702_v4 = vsub.f32 %v693_v0, %v701_v3 }
  0xbc   : > { %v703_v5 = vmul.f32 %v702_v4, %v702_v4 }
  0xbe   : > { %v704_v6 = vsel %vm696_vm0, %v703_v5, 0.0 }
  0xbf   : > { %705 = vadd.xlane.f32.xlu0 %v704_v6 }
 0x14c   : > { %v706_v12 = vpop.xlane.xlu0 %705 }
 0x14d   : > { %v707_v13 = vmul.f32 0.03125, %v706_v12 }
 0x14f   : > { %v708_v14 = vadd.f32 1e-12, %v707_v13 }
 0x151   : > { %3266 = vrsqrt.f32 %v708_v14 }
 0x15b   : > { %v3267_v15 = vpop.eup %3266 }
 0x15c   : > { %v710_v17 = vmul.f32 %v3267_v15, %v702_v4 }
 0x15e   : > { %v717_v19 = vmul.f32 %v2783_v16, %v710_v17 }
 0x160   : > { %v3588_v20 = vadd.f32 %v2784_v18, %v717_v19 }
 0x162   : > { %v732_v22 = vpack.c.bf16 %v3588_v20, %v3588_v20 }
 0x164   : > { %2986 = vmatmul.mubr.msk.bf16.vlgmr.msra.gmra.mrb[0].mxu0 %vm696_vm0, %v732_v22  ;;  %2994 = vmatmul.mubr.msk.bf16.vlgmr.msra.gmra.mrb[0].mxu1 %vm696_vm0, %v732_v22 }
 0x165   : > { %2998 = vmatpush3.bf16.msra.mxu0 %v3240_v21  ;;  %3001 = vmatprep.mubr.msk.bf16.mxu0 %vm3379_vm1, %v3378_v9 }
 0x166   : > { %2999 = vmatprep.subr.bf16.mxu0 %v3378_v9  ;;  %3007 = vmatprep.mubr.msk.bf16.mxu1 %vm3379_vm1, %v3378_v9 }
 0x169   : > { %3000 = vmatpush3.bf16.msra.mxu0 %v3241_v23 }
 0x16a   : > { %3011 = vmatprep.subr.bf16.mxu0 %v3378_v9 }
 0x16c   : > { %3002 = vmatmul.mubr.msk.bf16.vlgmr.msra.gmra.mrb[4].mxu0 %vm696_vm0, %v732_v22 }
 0x16d   : > { %3013 = vmatprep.mubr.msk.bf16.mxu0 %vm3379_vm1, %v3378_v9 }
 0x237   : > { %v793_v26 = vpop.f32.mrb[0].mxu0  ;;  %v857_v27 = vpop.f32.mrb[0].mxu1 }
 0x238   : > { %v858_v28 = vadd.f32 %v2790_v24, %v857_v27  ;;  %v2987_v29 = vpop.f32.mrb[1].mxu0  ;;  %v2995_v30 = vpop.f32.mrb[1].mxu1  ;;  %v794_v33 = vadd.f32 %v2786_v25, %v793_v26 }
 0x239   : > { %v796_v31 = vpop.f32.mrb[2].mxu0  ;;  %v860_v32 = vpop.f32.mrb[2].mxu1 }
 0x23a   : > { %v863_v34 = vpack.c.bf16 %v858_v28, %v858_v28  ;;  %v2988_v35 = vpop.f32.mrb[3].mxu0  ;;  %v2996_v36 = vpop.f32.mrb[3].mxu1  ;;  %v799_v39 = vpack.c.bf16 %v794_v33, %v794_v33 }
 0x23c   : > { %1153 = vrot.lane.b32.xlu0 %v863_v34, %s3380_s5  ;;  %1040 = vrot.lane.b32.xlu1 %v863_v34, %s3381_s2  ;;  %v933_v37 = vsel %vm928_vm2, %v863_v34, 0 }
 0x23d   : > { %3006 = vmatpush3.bf16.xpose.msra.mxu1 %v933_v37 }
 0x23e   : > { %3017 = vmatprep.subr.bf16.mxu1 %v3378_v9 }
 0x23f   : > { %v921_v40 = vpop.f32.mrb[4].mxu0 }
 0x240   : > { %v922_v41 = vadd.f32 %v2794_v38, %v921_v40  ;;  %1037 = vrot.lane.b32.xlu1 %v799_v39, %s3381_s2  ;;  %v3003_v42 = vpop.f32.mrb[5].mxu0 }
 0x241   : > { %v924_v43 = vpop.f32.mrb[6].mxu0 }
 0x242   : > { %v3623_v44 = vpack.c.bf16 %v922_v41, %v922_v41  ;;  %v3004_v45 = vpop.f32.mrb[7].mxu0 }
 0x244   : > { %1151 = vrot.lane.b32.xlu1 %v799_v39, %s3380_s5  ;;  %3008 = vmatmul.mubr.msk.bf16.vlgmr.msra.gmra.mrb[4].mxu1 %vm928_vm2, %v799_v39  ;;  %v994_v46 = vsel %vm992_vm3, %v3623_v44, 0 }
 0x245   : > { %3012 = vmatpush3.bf16.msra.mxu0 %v994_v46  ;;  %3019 = vmatprep.mubr.msk.bf16.mxu1 %vm3379_vm1, %v3378_v9 }
 0x246   : > { %3023 = vmatprep.subr.bf16.mxu0 %v3378_v9 }
 0x248   : > { %1265 = vrot.lane.b32.xlu1 %v863_v34, %s4041_s1 }
 0x24c   : > { %1263 = vrot.lane.b32.xlu1 %v799_v39, %s4041_s1 }
 0x2ae   : > { %v1041_v47 = vpop.permute.xlu1 %1040  ;;  %v1154_v50 = vpop.permute.xlu0 %1153 }
 0x2af   : > { %v1046_v48 = vsel %vm928_vm2, %v1041_v47, 0  ;;  %v1159_v52 = vsel %vm928_vm2, %v1154_v50, 0 }
 0x2b0   : > { %3018 = vmatpush3.bf16.xpose.msra.mxu1 %v1046_v48 }
 0x2b1   : > { %3029 = vmatprep.subr.bf16.mxu1 %v3378_v9 }
 0x2b2   : > { %v1038_v49 = vpop.permute.xlu1 %1037 }
 0x2b6   : > { %v1152_v51 = vpop.permute.xlu1 %1151 }
 0x2b7   : > { %3020 = vmatmul.mubr.msk.bf16.vlgmr.msra.gmra.mrb[8].mxu1 %vm928_vm2, %v1038_v49 }
 0x2b8   : > { %3030 = vmatpush3.bf16.xpose.msra.mxu1 %v1159_v52  ;;  %3031 = vmatprep.mubr.msk.bf16.mxu1 %vm3379_vm1, %v3378_v9 }
 0x2b9   : > { %3041 = vmatprep.subr.bf16.mxu1 %v3378_v9 }
 0x2ba   : > { %v1266_v53 = vpop.permute.xlu1 %1265 }
 0x2bb   : > { %v1271_v54 = vsel %vm928_vm2, %v1266_v53, 0 }
 0x2be   : > { %v1264_v55 = vpop.permute.xlu1 %1263 }
 0x2bf   : > { %3032 = vmatmul.mubr.msk.bf16.vlgmr.msra.gmra.mrb[12].mxu1 %vm928_vm2, %v1152_v51 }
 0x2c0   : > { %3042 = vmatpush3.bf16.xpose.msra.mxu1 %v1271_v54  ;;  %3043 = vmatprep.mubr.msk.bf16.mxu1 %vm3379_vm1, %v3378_v9 }
 0x2c1   : > { %3053 = vmatprep.subr.bf16.mxu1 %v3378_v9 }
 0x2c7   : > { %3044 = vmatmul.mubr.msk.bf16.vlgmr.msra.gmra.mrb[16].mxu1 %vm928_vm2, %v1264_v55 }
 0x2c8   : > { %3057 = vmatprep.mubr.msk.bf16.mxu1 %vm3379_vm1, %v3378_v9 }
 0x317   : > { %v969_v57 = vpop.f32.mrb[4].mxu1 }
 0x318   : > { %v975_v58 = vmul.f32 0.35355338, %v969_v57  ;;  %v3009_v59 = vpop.f32.mrb[5].mxu1 }
 0x319   : > { %v972_v60 = vpop.f32.mrb[6].mxu1 }
 0x31a   : > { %v3010_v61 = vpop.f32.mrb[7].mxu1  ;;  %v976_v62 = vadd.f32 %v3653_v56, %v975_v58 }
 0x31c   : > { %v977_v63 = vsel %vm928_vm2, %v976_v62, -inf }
 0x31d   : > { %978 = vmax.xlane.f32.xlu1 %v977_v63 }
 0x38a   : > { %v1082_v0 = vpop.f32.mrb[8].mxu1 }
 0x38b   : > { %v1088_v1 = vmul.f32 0.35355338, %v1082_v0  ;;  %v3021_v2 = vpop.f32.mrb[9].mxu1 }
 0x38c   : > { %v1085_v3 = vpop.f32.mrb[10].mxu1 }
 0x38d   : > { %v3022_v4 = vpop.f32.mrb[11].mxu1  ;;  %v1089_v5 = vadd.f32 %v3653_v56, %v1088_v1 }
 0x38f   : > { %v1090_v6 = vsel %vm928_vm2, %v1089_v5, -inf }
 0x390   : > { %1091 = vmax.xlane.f32.xlu0 %v1090_v6  ;;  %v3242_v6 = vld [vmem:[%s4015_s10] sm:$0xff]  }
 0x391   : > { %3054 = vmatpush3.bf16.msra.mxu1 %v3242_v6 }
 0x392   : > { %v1195_v7 = vpop.f32.mrb[12].mxu1  ;;  %3055 = vmatprep.subr.bf16.mxu1 %v3378_v9 }
 0x393   : > { %v1201_v8 = vmul.f32 0.35355338, %v1195_v7  ;;  %v3033_v10 = vpop.f32.mrb[13].mxu1 }
 0x394   : > { %v1198_v11 = vpop.f32.mrb[14].mxu1 }
 0x395   : > { %v3034_v12 = vpop.f32.mrb[15].mxu1  ;;  %v1202_v13 = vadd.f32 %v3653_v56, %v1201_v8 }
 0x397   : > { %v1203_v14 = vsel %vm928_vm2, %v1202_v13, -inf }
 0x398   : > { %1204 = vmax.xlane.f32.xlu1 %v1203_v14 }
 0x39a   : > { %v1307_v15 = vpop.f32.mrb[16].mxu1 }
 0x39b   : > { %v1313_v16 = vmul.f32 0.35355338, %v1307_v15  ;;  %v3045_v17 = vpop.f32.mrb[17].mxu1 }
 0x39c   : > { %v1310_v18 = vpop.f32.mrb[18].mxu1 }
 0x39d   : > { %v3046_v19 = vpop.f32.mrb[19].mxu1  ;;  %v1314_v21 = vadd.f32 %v3653_v56, %v1313_v16  ;;  %v3243_v16 = vld [vmem:[%s4015_s10 + $0x8] sm:$0xff]  }
 0x39e   : > { %3056 = vmatpush3.bf16.msra.mxu1 %v3243_v16 }
 0x39f   : > { %v1315_v22 = vsel %vm928_vm2, %v1314_v21, -inf  ;;  %3069 = vmatprep.subr.bf16.mxu1 %v3378_v9 }
 0x3a0   : > { %1316 = vmax.xlane.f32.xlu1 %v1315_v22 }
 0x3aa   : > { %v979_v23 = vpop.xlane.xlu1 %978 }
 0x3ab   : > { %v980_v24 = vsub.f32 %v976_v62, %v979_v23 }
 0x3ad   : > { %v981_v25 = vmul.f32 1.442695, %v980_v24 }
 0x3af   : > { %3268 = vpow2.f32 %v981_v25 }
 0x3b9   : > { %v3269_v26 = vpop.eup %3268 }
 0x3ba   : > { %v983_v27 = vsel %vm928_vm2, %v3269_v26, 0.0 }
 0x3bb   : > { %984 = vadd.xlane.f32.xlu0 %v983_v27 }
 0x41d   : > { %v1092_v28 = vpop.xlane.xlu0 %1091 }
 0x41e   : > { %v1093_v29 = vsub.f32 %v1089_v5, %v1092_v28 }
 0x420   : > { %v1094_v30 = vmul.f32 1.442695, %v1093_v29  ;;  %v2806_v29 = vld [vmem:[%s4016_s11] ss:$0 sm:$0xff] }
 0x422   : > { %3270 = vpow2.f32 %v1094_v30 }
 0x425   : > { %v1205_v31 = vpop.xlane.xlu1 %1204 }
 0x426   : > { %v1206_v32 = vsub.f32 %v1202_v13, %v1205_v31 }
 0x428   : > { %v1207_v33 = vmul.f32 1.442695, %v1206_v32 }
 0x42a   : > { %3272 = vpow2.f32 %v1207_v33 }
 0x42c   : > { %v3271_v34 = vpop.eup %3270 }
 0x42d   : > { %v1096_v35 = vsel %vm928_vm2, %v3271_v34, 0.0  ;;  %v1317_v39 = vpop.xlane.xlu1 %1316 }
 0x42e   : > { %1097 = vadd.xlane.f32.xlu1 %v1096_v35  ;;  %v1318_v40 = vsub.f32 %v1314_v21, %v1317_v39 }
 0x430   : > { %v1319_v41 = vmul.f32 1.442695, %v1318_v40 }
 0x434   : > { %v3273_v36 = vpop.eup %3272 }
 0x435   : > { %v1209_v37 = vsel %vm928_vm2, %v3273_v36, 0.0 }
 0x436   : > { %1210 = vadd.xlane.f32.xlu0 %v1209_v37 }
 0x43f   : > { %1215 = vrot.lane.b32.xlu1 %v3623_v44, %s3380_s5 }
 0x448   : > { %v985_v38 = vpop.xlane.xlu0 %984 }
 0x449   : > { %3274 = vrcp.f32 %v985_v38 }
 0x44a   : > { %3276 = vpow2.f32 %v1319_v41 }
 0x44c   : > { %1103 = vrot.lane.b32.xlu0 %v3623_v44, %s3381_s2 }
 0x453   : > { %v3275_v42 = vpop.eup %3274 }
 0x454   : > { %v987_v43 = vmul.f32 %v3275_v42, %v3269_v26  ;;  %v3277_v46 = vpop.eup %3276  ;;  %v3244_v42 = vld [vmem:[%s4019_s14] sm:$0xff]  }
 0x455   : > { %v1321_v47 = vsel %vm928_vm2, %v3277_v46, 0.0 }
 0x456   : > { %v988_v45 = vpack.c.bf16 %v987_v43, %v987_v43 }
 0x458   : > { %3014 = vmatmul.mubr.msk.bf16.vlgmr.msra.gmra.mrb[8].mxu0 %vm928_vm2, %v988_v45 }
 0x459   : > { %3025 = vmatprep.mubr.msk.bf16.mxu0 %vm3379_vm1, %v3378_v9 }
 0x463   : > { %1322 = vadd.xlane.f32.xlu1 %v1321_v47 }
 0x474   : > { %1327 = vrot.lane.b32.xlu1 %v3623_v44, %s4041_s1 }
 0x4bb   : > { %v1098_v48 = vpop.xlane.xlu1 %1097 }
 0x4bc   : > { %3278 = vrcp.f32 %v1098_v48  ;;  %v2810_v48 = vld [vmem:[%s4017_s12] ss:$0 sm:$0xff] }
 0x4bf   : > { %v1216_v54 = vpop.permute.xlu1 %1215 }
 0x4c0   : > { %v1221_v57 = vsel %vm992_vm3, %v1216_v54, 0  ;;  %v3246_v54 = vld [vmem:[%s4021_s16] sm:$0xff]  }
 0x4c3   : > { %v1211_v49 = vpop.xlane.xlu0 %1210 }
 0x4c4   : > { %3280 = vrcp.f32 %v1211_v49 }
 0x4c6   : > { %v3279_v50 = vpop.eup %3278 }
 0x4c7   : > { %v1100_v51 = vmul.f32 %v3279_v50, %v3271_v34  ;;  %v1104_v52 = vpop.permute.xlu0 %1103  ;;  %v2811_v50 = vld [vmem:[%s4018_s13] ss:$0 sm:$0xff] }
 0x4c8   : > { %v1109_v53 = vsel %vm992_vm3, %v1104_v52, 0 }
 0x4c9   : > { %3024 = vmatpush3.bf16.msra.mxu0 %v1109_v53  ;;  %v1101_v55 = vpack.c.bf16 %v1100_v51, %v1100_v51 }
 0x4ca   : > { %3035 = vmatprep.subr.bf16.mxu0 %v3378_v9 }
 0x4cc   : > { %3026 = vmatmul.mubr.msk.bf16.vlgmr.msra.gmra.mrb[12].mxu0 %vm928_vm2, %v1101_v55  ;;  %v3247_v55 = vld [vmem:[%s4021_s16 + $0x8] sm:$0xff]  }
 0x4cd   : > { %3036 = vmatpush3.bf16.msra.mxu0 %v1221_v57  ;;  %3037 = vmatprep.mubr.msk.bf16.mxu0 %vm3379_vm1, %v3378_v9  ;;  %v3248_v57 = vld [vmem:[%s4021_s16 + $0x10] sm:$0xff]  }
 0x4ce   : > { %v3281_v44 = vpop.eup %3280  ;;  %3047 = vmatprep.subr.bf16.mxu0 %v3378_v9 }
 0x4cf   : > { %v1213_v58 = vmul.f32 %v3281_v44, %v3273_v36  ;;  %v3249_v44 = vld [vmem:[%s4021_s16 + $0x18] sm:$0xff]  }
 0x4d1   : > { %v1214_v59 = vpack.c.bf16 %v1213_v58, %v1213_v58  ;;  %v2812_v58 = vld [vmem:[%s4020_s15] ss:$0 sm:$0xff] }
 0x4d4   : > { %3038 = vmatmul.mubr.msk.bf16.vlgmr.msra.gmra.mrb[16].mxu0 %vm928_vm2, %v1214_v59 }
 0x4d5   : > { %3049 = vmatprep.mubr.msk.bf16.mxu0 %vm3379_vm1, %v3378_v9 }
 0x4f0   : > { %v1323_v60 = vpop.xlane.xlu1 %1322 }
 0x4f1   : > { %3282 = vrcp.f32 %v1323_v60 }
 0x4f4   : > { %v1328_v61 = vpop.permute.xlu1 %1327 }
 0x4f5   : > { %v1333_v62 = vsel %vm992_vm3, %v1328_v61, 0 }
 0x4f6   : > { %3048 = vmatpush3.bf16.msra.mxu0 %v1333_v62 }
 0x4f7   : > { %3061 = vmatprep.subr.bf16.mxu0 %v3378_v9 }
 0x4fb   : > { %v3283_v63 = vpop.eup %3282 }
 0x4fc   : > { %v1325_v0 = vmul.f32 %v3283_v63, %v3277_v46 }
 0x4fe   : > { %v1326_v1 = vpack.c.bf16 %v1325_v0, %v1325_v0 }
 0x500   : > { %3050 = vmatmul.mubr.msk.bf16.vlgmr.msra.gmra.mrb[20].mxu0 %vm928_vm2, %v1326_v1 }
 0x501   : > { %3065 = vmatprep.mubr.msk.bf16.mxu0 %vm3379_vm1, %v3378_v9  ;;  %3062 = vmatpush3.bf16.msra.mxu0 %v3244_v42  ;;  %v2847_v42 = vld [vmem:[%s4014_s9 + $0x1] ss:$0 sm:$0xff] }
 0x502   : > { %3063 = vmatprep.subr.bf16.mxu0 %v3378_v9 }
 0x52b   : > { %v1030_v2 = vpop.f32.mrb[8].mxu0 }
 0x52c   : > { %v3015_v3 = vpop.f32.mrb[9].mxu0 }
 0x52d   : > { %v1033_v4 = vpop.f32.mrb[10].mxu0 }
 0x52e   : > { %v3016_v5 = vpop.f32.mrb[11].mxu0 }
 0x59f   : > { %v1145_v7 = vpop.f32.mrb[12].mxu0 }
 0x5a0   : > { %1376 = vrot.lane.b32.xlu0 %v1145_v7, %s4040_s0  ;;  %v3027_v8 = vpop.f32.mrb[13].mxu0  ;;  %s4071_s0 = smov 104  }
 0x5a1   : > { %v1148_v10 = vpop.f32.mrb[14].mxu0 }
 0x5a2   : > { %v3028_v11 = vpop.f32.mrb[15].mxu0 }
 0x5a3   : > { %v2816_v11 = vld [vmem:[%s4022_s17] ss:$0 sm:$0xff] }
 0x5a7   : > { %v1257_v12 = vpop.f32.mrb[16].mxu0 }
 0x5a8   : > { %1380 = vrot.lane.b32.xlu1 %v1257_v12, %s4039_s3  ;;  %v3039_v13 = vpop.f32.mrb[17].mxu0 }
 0x5a9   : > { %v1260_v14 = vpop.f32.mrb[18].mxu0 }
 0x5aa   : > { %v3040_v15 = vpop.f32.mrb[19].mxu0 }
 0x5d3   : > { %v1369_v17 = vpop.f32.mrb[20].mxu0 }
 0x5d4   : > { %1384 = vrot.lane.b32.xlu0 %v1369_v17, %s4038_s24  ;;  %v3051_v18 = vpop.f32.mrb[21].mxu0  ;;  %s4072_s24 = smov 8  }
 0x5d5   : > { %v1372_v19 = vpop.f32.mrb[22].mxu0 }
 0x5d6   : > { %v3052_v21 = vpop.f32.mrb[23].mxu0 }
 0x612   : > { %v1377_v22 = vpop.permute.xlu0 %1376 }
 0x613   : > { %v1387_v24 = vsel %vm928_vm2, %v1030_v2, %v1377_v22 }
 0x61a   : > { %v1381_v23 = vpop.permute.xlu1 %1380 }
 0x61b   : > { %v1389_v25 = vsel %vm1388_vm4, %v1387_v24, %v1381_v23 }
 0x646   : > { %v1385_v26 = vpop.permute.xlu0 %1384 }
 0x647   : > { %v1391_v27 = vsel %vm1390_vm5, %v1389_v25, %v1385_v26  ;;  %v3250_v25 = vld [vmem:[%s4062_s23 + $0x10] sm:$0xff]  }
 0x648   : > { %v1392_v28 = vpack.c.bf16 %v1391_v27, %v1391_v27  ;;  %v3251_v26 = vld [vmem:[%s4067_s8 + $0x10] sm:$0xff]   ;;  %v3252_v27 = vld [vmem:[%s4062_s23 + $0x18] sm:$0xff]  }
 0x64a   : > { %3058 = vmatmul.mubr.msk.bf16.vlgmr.msra.gmra.mrb[20].mxu1 %vm696_vm0, %v1392_v28  ;;  %v3253_v28 = vld [vmem:[%s4067_s8 + $0x18] sm:$0xff]  }
 0x64b   : > { %3077 = vmatprep.mubr.msk.bf16.mxu1 %vm3379_vm1, %v3378_v9  ;;  %3070 = vmatpush3.bf16.msra.mxu1 %v3246_v54 }
 0x64c   : > { %3071 = vmatprep.subr.bf16.mxu1 %v3378_v9 }
 0x64f   : > { %3072 = vmatpush3.bf16.msra.mxu1 %v3247_v55 }
 0x650   : > { %3073 = vmatprep.subr.bf16.mxu1 %v3378_v9 }
 0x653   : > { %3074 = vmatpush3.bf16.msra.mxu1 %v3248_v57  ;;  %v2838_v57 = vld [vmem:[%s4068_s7 + $0x1] ss:$0 sm:$0xff] }
 0x654   : > { %3075 = vmatprep.subr.bf16.mxu1 %v3378_v9 }
 0x657   : > { %3076 = vmatpush3.bf16.msra.mxu1 %v3249_v44 }
 0x658   : > { %3097 = vmatprep.subr.bf16.mxu1 %v3378_v9 }
 0x71d   : > { %v1453_v30 = vpop.f32.mrb[20].mxu1 }
 0x71e   : > { %v1454_v31 = vadd.f32 %v2806_v29, %v1453_v30  ;;  %v3059_v32 = vpop.f32.mrb[21].mxu1 }
 0x71f   : > { %v1456_v33 = vpop.f32.mrb[22].mxu1 }
 0x720   : > { %v3060_v34 = vpop.f32.mrb[23].mxu1  ;;  %v1459_v35 = vadd.f32 %v1454_v31, %v3588_v20  ;;  %v3245_v20 = vld [vmem:[%s4019_s14 + $0x8] sm:$0xff]   ;;  %v2822_v33 = vld [vmem:[%s4023_s18] ss:$0 sm:$0xff] }
 0x721   : > { %3064 = vmatpush3.bf16.msra.mxu0 %v3245_v20 }
 0x722   : > { %v1462_v36 = vsel %vm696_vm0, %v1459_v35, 0.0  ;;  %3081 = vmatprep.subr.bf16.mxu0 %v3378_v9 }
 0x723   : > { %1463 = vadd.xlane.f32.xlu1 %v1462_v36 }
 0x7b0   : > { %v1464_v37 = vpop.xlane.xlu1 %1463 }
 0x7b1   : > { %v1465_v38 = vmul.f32 0.03125, %v1464_v37 }
 0x7b3   : > { %v1466_v39 = vsub.f32 %v1459_v35, %v1465_v38  ;;  %v2823_v35 = vld [vmem:[%s4024_s19] ss:$0 sm:$0xff]  ;;  %v3254_v38 = vld [vmem:[%s4064_s22 + $0x10] sm:$0xff]  }
 0x7b5   : > { %v1467_v40 = vmul.f32 %v1466_v39, %v1466_v39 }
 0x7b7   : > { %v1468_v41 = vsel %vm696_vm0, %v1467_v40, 0.0  ;;  %v3255_v40 = vld [vmem:[%s4064_s22 + $0x18] sm:$0xff]  }
 0x7b8   : > { %1469 = vadd.xlane.f32.xlu0 %v1468_v41  ;;  %v2829_v41 = vld [vmem:[%s4069_s25 + $0x1] ss:$0 sm:$0xff] }
 0x845   : > { %v1470_v43 = vpop.xlane.xlu0 %1469 }
 0x846   : > { %v1471_v45 = vmul.f32 0.03125, %v1470_v43 }
 0x848   : > { %v1472_v46 = vadd.f32 1e-12, %v1471_v45 }
 0x84a   : > { %3284 = vrsqrt.f32 %v1472_v46 }
 0x854   : > { %v3285_v47 = vpop.eup %3284 }
 0x855   : > { %v1474_v49 = vmul.f32 %v3285_v47, %v1466_v39 }
 0x857   : > { %v1481_v51 = vmul.f32 %v2810_v48, %v1474_v49 }
 0x859   : > { %v1488_v52 = vadd.f32 %v2811_v50, %v1481_v51 }
 0x85b   : > { %v1489_v53 = vpack.c.bf16 %v1488_v52, %v1488_v52 }
 0x85d   : > { %3066 = vmatmul.mubr.msk.bf16.vlgmr.msra.gmra.mrb[24].mxu0 %vm696_vm0, %v1489_v53 }
 0x85e   : > { %3085 = vmatprep.mubr.msk.bf16.mxu0 %vm3379_vm1, %v3378_v9  ;;  %3082 = vmatpush3.bf16.msra.mxu0 %v3250_v25 }
 0x85f   : > { %3083 = vmatprep.subr.bf16.mxu0 %v3378_v9 }
 0x862   : > { %3084 = vmatpush3.bf16.msra.mxu0 %v3252_v27 }
 0x863   : > { %3089 = vmatprep.subr.bf16.mxu0 %v3378_v9 }
 0x930   : > { %v1550_v59 = vpop.f32.mrb[24].mxu0 }
 0x931   : > { %v1551_v60 = vadd.f32 %v2812_v58, %v1550_v59  ;;  %v3067_v61 = vpop.f32.mrb[25].mxu0 }
 0x932   : > { %v1553_v62 = vpop.f32.mrb[26].mxu0 }
 0x933   : > { %v1556_v63 = vmul.f32 %v1551_v60, %v1551_v60  ;;  %v3068_v0 = vpop.f32.mrb[27].mxu0 }
 0x935   : > { %v1557_v1 = vmul.f32 %v1556_v63, %v1551_v60 }
 0x937   : > { %v1558_v2 = vmul.f32 0.044715, %v1557_v1 }
 0x939   : > { %v1559_v3 = vadd.f32 %v1558_v2, %v1551_v60 }
 0x93b   : > { %v1560_v4 = vmul.f32 0.7978846, %v1559_v3 }
 0x93d   : > { %3286 = vtanh.f32 %v1560_v4 }
 0x947   : > { %v3287_v5 = vpop.eup %3286 }
 0x948   : > { %v1562_v6 = vadd.f32 1.0, %v3287_v5 }
 0x94a   : > { %v1563_v7 = vmul.f32 0.5, %v1562_v6 }
 0x94c   : > { %v1564_v8 = vmul.f32 %v1563_v7, %v1551_v60 }
 0x94e   : > { %v1565_v10 = vpack.c.bf16 %v1564_v8, %v1564_v8 }
 0x950   : > { %3078 = vmatmul.mubr.msk.bf16.vlgmr.msra.gmra.mrb[24].mxu1 %vm1605_vm6, %v1565_v10 }
 0x951   : > { %3101 = vmatprep.mubr.msk.bf16.mxu1 %vm3379_vm1, %v3378_v9  ;;  %3098 = vmatpush3.bf16.msra.mxu1 %v3251_v26 }
 0x952   : > { %3099 = vmatprep.subr.bf16.mxu1 %v3378_v9 }
 0x955   : > { %3100 = vmatpush3.bf16.msra.mxu1 %v3253_v28 }
 0x956   : > { %3111 = vmatprep.subr.bf16.mxu1 %v3378_v9 }
 0xa23   : > { %v1643_v12 = vpop.f32.mrb[24].mxu1 }
 0xa24   : > { %v1644_v13 = vadd.f32 %v2816_v11, %v1643_v12  ;;  %v3079_v14 = vpop.f32.mrb[25].mxu1 }
 0xa25   : > { %v1646_v15 = vpop.f32.mrb[26].mxu1 }
 0xa26   : > { %v3080_v16 = vpop.f32.mrb[27].mxu1  ;;  %v1649_v17 = vadd.f32 %v1644_v13, %v1488_v52 }
 0xa28   : > { %v1652_v18 = vsel %vm696_vm0, %v1649_v17, 0.0 }
 0xa29   : > { %1653 = vadd.xlane.f32.xlu0 %v1652_v18 }
 0xab6   : > { %v1654_v19 = vpop.xlane.xlu0 %1653 }
 0xab7   : > { %v1655_v21 = vmul.f32 0.03125, %v1654_v19 }
 0xab9   : > { %v1656_v22 = vsub.f32 %v1649_v17, %v1655_v21 }
 0xabb   : > { %v1657_v23 = vmul.f32 %v1656_v22, %v1656_v22 }
 0xabd   : > { %v1658_v24 = vsel %vm696_vm0, %v1657_v23, 0.0 }
 0xabe   : > { %1659 = vadd.xlane.f32.xlu1 %v1658_v24 }
 0xb4b   : > { %v1660_v29 = vpop.xlane.xlu1 %1659 }
 0xb4c   : > { %v1661_v30 = vmul.f32 0.03125, %v1660_v29 }
 0xb4e   : > { %v1662_v31 = vadd.f32 1e-12, %v1661_v30 }
 0xb50   : > { %3288 = vrsqrt.f32 %v1662_v31 }
 0xb5a   : > { %v3289_v32 = vpop.eup %3288 }
 0xb5b   : > { %v1664_v34 = vmul.f32 %v3289_v32, %v1656_v22 }
 0xb5d   : > { %v1671_v36 = vmul.f32 %v2822_v33, %v1664_v34 }
 0xb5f   : > { %v3780_v37 = vadd.f32 %v2823_v35, %v1671_v36 }
 0xb61   : > { %v1679_v39 = vpack.c.bf16 %v3780_v37, %v3780_v37 }
 0xb63   : > { %3086 = vmatmul.mubr.msk.bf16.vlgmr.msra.gmra.mrb[28].mxu0 %vm696_vm0, %v1679_v39  ;;  %3102 = vmatmul.mubr.msk.bf16.vlgmr.msra.gmra.mrb[28].mxu1 %vm696_vm0, %v1679_v39 }
 0xb64   : > { %3090 = vmatpush3.bf16.msra.mxu0 %v3254_v38  ;;  %3093 = vmatprep.mubr.msk.bf16.mxu0 %vm3379_vm1, %v3378_v9 }
 0xb65   : > { %3091 = vmatprep.subr.bf16.mxu0 %v3378_v9  ;;  %3113 = vmatprep.mubr.msk.bf16.mxu1 %vm3379_vm1, %v3378_v9 }
 0xb68   : > { %3092 = vmatpush3.bf16.msra.mxu0 %v3255_v40 }
 0xb69   : > { %3105 = vmatprep.subr.bf16.mxu0 %v3378_v9 }
 0xb6b   : > { %3094 = vmatmul.mubr.msk.bf16.vlgmr.msra.gmra.mrb[32].mxu0 %vm696_vm0, %v1679_v39 }
 0xb6c   : > { %3107 = vmatprep.mubr.msk.bf16.mxu0 %vm3379_vm1, %v3378_v9 }
 0xc36   : > { %v1742_v20 = vpop.f32.mrb[28].mxu0  ;;  %v1874_v43 = vpop.f32.mrb[28].mxu1 }
 0xc37   : > { %v1743_v45 = vadd.f32 %v2829_v41, %v1742_v20  ;;  %v1875_v46 = vadd.f32 %v2847_v42, %v1874_v43  ;;  %v3087_v47 = vpop.f32.mrb[29].mxu0  ;;  %v3103_v48 = vpop.f32.mrb[29].mxu1 }
 0xc38   : > { %v1745_v49 = vpop.f32.mrb[30].mxu0  ;;  %v1877_v50 = vpop.f32.mrb[30].mxu1 }
 0xc39   : > { %v1748_v51 = vpack.c.bf16 %v1743_v45, %v1743_v45  ;;  %v3807_v52 = vpack.c.bf16 %v1875_v46, %v1875_v46  ;;  %v3088_v53 = vpop.f32.mrb[31].mxu0  ;;  %v3104_v54 = vpop.f32.mrb[31].mxu1 }
 0xc3b   : > { %1988 = vrot.lane.b32.xlu1 %v1748_v51, %s3381_s2  ;;  %v1945_v55 = vsel %vm992_vm3, %v3807_v52, 0 }
 0xc3c   : > { %3112 = vmatpush3.bf16.msra.mxu1 %v1945_v55 }
 0xc3d   : > { %3123 = vmatprep.subr.bf16.mxu1 %v3378_v9 }
 0xc3e   : > { %v1808_v44 = vpop.f32.mrb[32].mxu0 }
 0xc3f   : > { %v1809_v58 = vadd.f32 %v2838_v57, %v1808_v44  ;;  %v3095_v59 = vpop.f32.mrb[33].mxu0 }
 0xc40   : > { %v1811_v60 = vpop.f32.mrb[34].mxu0 }
 0xc41   : > { %v1814_v61 = vpack.c.bf16 %v1809_v58, %v1809_v58  ;;  %v3096_v62 = vpop.f32.mrb[35].mxu0 }
 0xc43   : > { %2104 = vrot.lane.b32.xlu1 %v1814_v61, %s3380_s5  ;;  %1991 = vrot.lane.b32.xlu0 %v1814_v61, %s3381_s2  ;;  %v1885_v63 = vsel %vm928_vm2, %v1814_v61, 0 }
 0xc44   : > { %3106 = vmatpush3.bf16.xpose.msra.mxu0 %v1885_v63 }
 0xc45   : > { %3117 = vmatprep.subr.bf16.mxu0 %v3378_v9 }
 0xc47   : > { %2216 = vrot.lane.b32.xlu1 %v1814_v61, %s4071_s0  ;;  %2102 = vrot.lane.b32.xlu0 %v1748_v51, %s3380_s5 }
 0xc4b   : > { %2214 = vrot.lane.b32.xlu0 %v1748_v51, %s4071_s0  ;;  %3108 = vmatmul.mubr.msk.bf16.vlgmr.msra.gmra.mrb[36].mxu0 %vm928_vm2, %v1748_v51 }
 0xc4c   : > { %3119 = vmatprep.mubr.msk.bf16.mxu0 %vm3379_vm1, %v3378_v9 }
 0xcad   : > { %v1989_v2 = vpop.permute.xlu1 %1988 }
 0xcb5   : > { %v1992_v0 = vpop.permute.xlu0 %1991  ;;  %v2105_v3 = vpop.permute.xlu1 %2104 }
 0xcb6   : > { %v1997_v1 = vsel %vm928_vm2, %v1992_v0, 0  ;;  %v2110_v4 = vsel %vm928_vm2, %v2105_v3, 0 }
 0xcb7   : > { %3118 = vmatpush3.bf16.xpose.msra.mxu0 %v1997_v1 }
 0xcb8   : > { %3129 = vmatprep.subr.bf16.mxu0 %v3378_v9 }
 0xcb9   : > { %v2217_v5 = vpop.permute.xlu1 %2216  ;;  %v2103_v6 = vpop.permute.xlu0 %2102 }
 0xcba   : > { %v2222_v7 = vsel %vm928_vm2, %v2217_v5, 0 }
 0xcbd   : > { %v2215_v8 = vpop.permute.xlu0 %2214 }
 0xcbe   : > { %3120 = vmatmul.mubr.msk.bf16.vlgmr.msra.gmra.mrb[40].mxu0 %vm928_vm2, %v1989_v2 }
 0xcbf   : > { %3130 = vmatpush3.bf16.xpose.msra.mxu0 %v2110_v4  ;;  %3131 = vmatprep.mubr.msk.bf16.mxu0 %vm3379_vm1, %v3378_v9 }
 0xcc0   : > { %3141 = vmatprep.subr.bf16.mxu0 %v3378_v9 }
 0xcc6   : > { %3132 = vmatmul.mubr.msk.bf16.vlgmr.msra.gmra.mrb[44].mxu0 %vm928_vm2, %v2103_v6 }
 0xcc7   : > { %3142 = vmatpush3.bf16.xpose.msra.mxu0 %v2222_v7  ;;  %3143 = vmatprep.mubr.msk.bf16.mxu0 %vm3379_vm1, %v3378_v9 }
 0xcc8   : > { %3153 = vmatprep.subr.bf16.mxu0 %v3378_v9 }
 0xcce   : > { %3144 = vmatmul.mubr.msk.bf16.vlgmr.msra.gmra.mrb[48].mxu0 %vm928_vm2, %v2215_v8 }
 0xccf   : > { %3157 = vmatprep.mubr.msk.bf16.mxu0 %vm3379_vm1, %v3378_v9 }
 0xd1e   : > { %v1921_v10 = vpop.f32.mrb[36].mxu0 }
 0xd1f   : > { %v1927_v11 = vmul.f32 0.35355338, %v1921_v10  ;;  %v3109_v12 = vpop.f32.mrb[37].mxu0 }
 0xd20   : > { %v1924_v13 = vpop.f32.mrb[38].mxu0 }
 0xd21   : > { %v3110_v14 = vpop.f32.mrb[39].mxu0  ;;  %v1928_v15 = vadd.f32 %v3653_v56, %v1927_v11 }
 0xd23   : > { %v1929_v16 = vsel %vm928_vm2, %v1928_v15, -inf }
 0xd24   : > { %1930 = vmax.xlane.f32.xlu1 %v1929_v16 }
 0xd91   : > { %v2033_v17 = vpop.f32.mrb[40].mxu0 }
 0xd92   : > { %v2039_v18 = vmul.f32 0.35355338, %v2033_v17  ;;  %v3121_v19 = vpop.f32.mrb[41].mxu0 }
 0xd93   : > { %v2036_v21 = vpop.f32.mrb[42].mxu0 }
 0xd94   : > { %v3122_v22 = vpop.f32.mrb[43].mxu0  ;;  %v2040_v23 = vadd.f32 %v3653_v56, %v2039_v18 }
 0xd96   : > { %v2041_v24 = vsel %vm928_vm2, %v2040_v23, -inf }
 0xd97   : > { %2042 = vmax.xlane.f32.xlu0 %v2041_v24 }
 0xd99   : > { %v2146_v25 = vpop.f32.mrb[44].mxu0 }
 0xd9a   : > { %v2152_v26 = vmul.f32 0.35355338, %v2146_v25  ;;  %v3133_v27 = vpop.f32.mrb[45].mxu0 }
 0xd9b   : > { %v2149_v28 = vpop.f32.mrb[46].mxu0 }
 0xd9c   : > { %v3134_v29 = vpop.f32.mrb[47].mxu0  ;;  %v2153_v30 = vadd.f32 %v3653_v56, %v2152_v26 }
 0xd9e   : > { %v2154_v31 = vsel %vm928_vm2, %v2153_v30, -inf }
 0xd9f   : > { %2155 = vmax.xlane.f32.xlu0 %v2154_v31 }
 0xda1   : > { %v2258_v32 = vpop.f32.mrb[48].mxu0 }
 0xda2   : > { %v2264_v33 = vmul.f32 0.35355338, %v2258_v32  ;;  %v3145_v34 = vpop.f32.mrb[49].mxu0  ;;  %v3257_v32 = vld [vmem:[%s4015_s10 + $0x18] sm:$0xff]  }
 0xda3   : > { %v2261_v35 = vpop.f32.mrb[50].mxu0 }
 0xda4   : > { %v3146_v36 = vpop.f32.mrb[51].mxu0  ;;  %v2265_v38 = vadd.f32 %v3653_v56, %v2264_v33 }
 0xda6   : > { %v2266_v39 = vsel %vm928_vm2, %v2265_v38, -inf }
 0xda7   : > { %2267 = vmax.xlane.f32.xlu1 %v2266_v39 }
 0xdb1   : > { %v1931_v40 = vpop.xlane.xlu1 %1930 }
 0xdb2   : > { %v1932_v41 = vsub.f32 %v1928_v15, %v1931_v40 }
 0xdb4   : > { %v1933_v42 = vmul.f32 1.442695, %v1932_v41 }
 0xdb6   : > { %3290 = vpow2.f32 %v1933_v42 }
 0xdc0   : > { %v3291_v20 = vpop.eup %3290 }
 0xdc1   : > { %v1935_v43 = vsel %vm928_vm2, %v3291_v20, 0.0 }
 0xdc2   : > { %1936 = vadd.xlane.f32.xlu0 %v1935_v43 }
 0xe24   : > { %v2043_v45 = vpop.xlane.xlu0 %2042 }
 0xe25   : > { %v2044_v46 = vsub.f32 %v2040_v23, %v2043_v45  ;;  %v3256_v23 = vld [vmem:[%s4015_s10 + $0x10] sm:$0xff]   ;;  %v2864_v45 = vld [vmem:[%s4016_s11 + $0x1] ss:$0 sm:$0xff] }
 0xe26   : > { %3154 = vmatpush3.bf16.msra.mxu0 %v3256_v23 }
 0xe27   : > { %v2045_v47 = vmul.f32 1.442695, %v2044_v46  ;;  %3155 = vmatprep.subr.bf16.mxu0 %v3378_v9 }
 0xe29   : > { %3292 = vpow2.f32 %v2045_v47 }
 0xe2a   : > { %3156 = vmatpush3.bf16.msra.mxu0 %v3257_v32 }
 0xe2b   : > { %3169 = vmatprep.subr.bf16.mxu0 %v3378_v9 }
 0xe2c   : > { %v2156_v48 = vpop.xlane.xlu0 %2155 }
 0xe2d   : > { %v2157_v49 = vsub.f32 %v2153_v30, %v2156_v48 }
 0xe2f   : > { %v2158_v50 = vmul.f32 1.442695, %v2157_v49 }
 0xe31   : > { %3294 = vpow2.f32 %v2158_v50 }
 0xe33   : > { %v3293_v56 = vpop.eup %3292 }
 0xe34   : > { %v2047_v51 = vsel %vm928_vm2, %v3293_v56, 0.0  ;;  %v2268_v57 = vpop.xlane.xlu1 %2267 }
 0xe35   : > { %2048 = vadd.xlane.f32.xlu1 %v2047_v51  ;;  %v2269_v44 = vsub.f32 %v2265_v38, %v2268_v57 }
 0xe37   : > { %v2270_v58 = vmul.f32 1.442695, %v2269_v44 }
 0xe3b   : > { %v3295_v53 = vpop.eup %3294 }
 0xe3c   : > { %v2160_v54 = vsel %vm928_vm2, %v3295_v53, 0.0 }
 0xe3d   : > { %2161 = vadd.xlane.f32.xlu0 %v2160_v54 }
 0xe46   : > { %2166 = vrot.lane.b32.xlu1 %v3807_v52, %s3380_s5  ;;  %s2903_s5 = sshll.u32 %s3523_s4, 4  ;;  %s3386_s4 = smov [#allocation2]  }
 0xe47   : > { %s3318_s7 = sshll.u32 %s3386_s4, 4  ;;  %s3319_s7 = int_to_ptr.vmem [resolvable:$false] %s3318_s7 }
 0xe48   : > { %s3320_s8 = scalar_lea.vmem %s3319_s7, 32 }
 0xe4f   : > { %v1937_v55 = vpop.xlane.xlu0 %1936 }
 0xe50   : > { %3296 = vrcp.f32 %v1937_v55 }
 0xe51   : > { %3298 = vpow2.f32 %v2270_v58  ;;  %v3258_v58 = vld [vmem:[%s4019_s14 + $0x10] sm:$0xff]  }
 0xe53   : > { %2054 = vrot.lane.b32.xlu0 %v3807_v52, %s3381_s2 }
 0xe5a   : > { %v3297_v59 = vpop.eup %3296 }
 0xe5b   : > { %v1939_v60 = vmul.f32 %v3297_v59, %v3291_v20  ;;  %v3299_v62 = vpop.eup %3298 }
 0xe5c   : > { %v2272_v63 = vsel %vm928_vm2, %v3299_v62, 0.0 }
 0xe5d   : > { %v1940_v61 = vpack.c.bf16 %v1939_v60, %v1939_v60 }
 0xe5f   : > { %3114 = vmatmul.mubr.msk.bf16.vlgmr.msra.gmra.mrb[32].mxu1 %vm928_vm2, %v1940_v61 }
 0xe60   : > { %3125 = vmatprep.mubr.msk.bf16.mxu1 %vm3379_vm1, %v3378_v9 }
 0xe6a   : > { %2273 = vadd.xlane.f32.xlu1 %v2272_v63  ;;  %v2870_v63 = vld [vmem:[%s4017_s12 + $0x1] ss:$0 sm:$0xff] }
 0xe7b   : > { %2278 = vrot.lane.b32.xlu1 %v3807_v52, %s4071_s0  ;;  %s683_s0 = sand.u32 1, %s3368_s28  }
 0xe7c   : > { %s684_s2 = scalar_lea.vmem [#allocation2], %s683_s0  ;;  %s2702_s1 = scalar_lea.sflag [#allocation3], %s683_s0 }
 0xec2   : > { %v2049_v0 = vpop.xlane.xlu1 %2048 }
 0xec3   : > { %3300 = vrcp.f32 %v2049_v0 }
 0xec6   : > { %v2167_v6 = vpop.permute.xlu1 %2166 }
 0xec7   : > { %v2172_v8 = vsel %vm992_vm3, %v2167_v6, 0  ;;  %v3261_v6 = vld [vmem:[%s4021_s16 + $0x28] sm:$0xff]  }
 0xeca   : > { %v2162_v1 = vpop.xlane.xlu0 %2161 }
 0xecb   : > { %3302 = vrcp.f32 %v2162_v1  ;;  %v2871_v1 = vld [vmem:[%s4018_s13 + $0x1] ss:$0 sm:$0xff] }
 0xecd   : > { %v3301_v2 = vpop.eup %3300 }
 0xece   : > { %v2051_v3 = vmul.f32 %v3301_v2, %v3293_v56  ;;  %v2055_v4 = vpop.permute.xlu0 %2054 }
 0xecf   : > { %v2060_v5 = vsel %vm992_vm3, %v2055_v4, 0 }
 0xed0   : > { %3124 = vmatpush3.bf16.msra.mxu1 %v2060_v5  ;;  %v2052_v7 = vpack.c.bf16 %v2051_v3, %v2051_v3  ;;  %v3260_v5 = vld [vmem:[%s4021_s16 + $0x20] sm:$0xff]  }
 0xed1   : > { %3135 = vmatprep.subr.bf16.mxu1 %v3378_v9 }
 0xed3   : > { %3126 = vmatmul.mubr.msk.bf16.vlgmr.msra.gmra.mrb[36].mxu1 %vm928_vm2, %v2052_v7  ;;  %v3262_v7 = vld [vmem:[%s4021_s16 + $0x30] sm:$0xff]  }
 0xed4   : > { %3136 = vmatpush3.bf16.msra.mxu1 %v2172_v8  ;;  %3137 = vmatprep.mubr.msk.bf16.mxu1 %vm3379_vm1, %v3378_v9  ;;  %v3263_v8 = vld [vmem:[%s4021_s16 + $0x38] sm:$0xff]  }
 0xed5   : > { %v3303_v52 = vpop.eup %3302  ;;  %3147 = vmatprep.subr.bf16.mxu1 %v3378_v9 }
 0xed6   : > { %v2164_v10 = vmul.f32 %v3303_v52, %v3295_v53  ;;  %v2877_v52 = vld [vmem:[%s4020_s15 + $0x1] ss:$0 sm:$0xff] }
 0xed8   : > { %v2165_v11 = vpack.c.bf16 %v2164_v10, %v2164_v10 }
 0xedb   : > { %3138 = vmatmul.mubr.msk.bf16.vlgmr.msra.gmra.mrb[40].mxu1 %vm928_vm2, %v2165_v11 }
 0xedc   : > { %3149 = vmatprep.mubr.msk.bf16.mxu1 %vm3379_vm1, %v3378_v9 }
 0xef7   : > { %v2274_v12 = vpop.xlane.xlu1 %2273 }
 0xef8   : > { %3304 = vrcp.f32 %v2274_v12 }
 0xefb   : > { %v2279_v13 = vpop.permute.xlu1 %2278 }
 0xefc   : > { %v2284_v14 = vsel %vm992_vm3, %v2279_v13, 0 }
 0xefd   : > { %3148 = vmatpush3.bf16.msra.mxu1 %v2284_v14 }
 0xefe   : > { %3161 = vmatprep.subr.bf16.mxu1 %v3378_v9 }
 0xf02   : > { %v3305_v15 = vpop.eup %3304 }
 0xf03   : > { %v2276_v16 = vmul.f32 %v3305_v15, %v3299_v62 }
 0xf05   : > { %v2277_v17 = vpack.c.bf16 %v2276_v16, %v2276_v16 }
 0xf07   : > { %3150 = vmatmul.mubr.msk.bf16.vlgmr.msra.gmra.mrb[44].mxu1 %vm928_vm2, %v2277_v17 }
 0xf08   : > { %3165 = vmatprep.mubr.msk.bf16.mxu1 %vm3379_vm1, %v3378_v9  ;;  %3162 = vmatpush3.bf16.msra.mxu1 %v3258_v58 }
 0xf09   : > { %3163 = vmatprep.subr.bf16.mxu1 %v3378_v9 }
 0xf32   : > { %v1981_v18 = vpop.f32.mrb[32].mxu1 }
 0xf33   : > { %v3115_v19 = vpop.f32.mrb[33].mxu1 }
 0xf34   : > { %v1984_v21 = vpop.f32.mrb[34].mxu1 }
 0xf35   : > { %v3116_v22 = vpop.f32.mrb[35].mxu1 }
 0xfa6   : > { %v2096_v24 = vpop.f32.mrb[36].mxu1 }
 0xfa7   : > { %2327 = vrot.lane.b32.xlu0 %v2096_v24, %s4072_s24  ;;  %v3127_v25 = vpop.f32.mrb[37].mxu1  ;;  %s2714_s24 = sshll.u32 %s684_s2, 4  ;;  %s3965_s24 = int_to_ptr.vmem [resolvable:$true] %s2714_s24 }
 0xfa8   : > { %v2099_v26 = vpop.f32.mrb[38].mxu1  ;;  %s3314_s3 = scalar_lea.vmem %s3965_s24, 16  ;;  %p3321_p0 = scmp.lt.s32.totalorder %s3965_s24, %s3319_s7 }
 0xfa9   : > { %v3128_v27 = vpop.f32.mrb[39].mxu1  ;;  %v2890_v26 = vld [vmem:[%s4022_s17 + $0x1] ss:$0 sm:$0xff]  ;;  %p3315_p11 = scmp.ne.s32.totalorder %s3965_s24, %s3314_s3  ;;  %p3322_p1 = scmp.lt.s32.totalorder %s3320_s8, %s3314_s3 }
 0xfab   : > { %p3316_p12 = pnand %p3315_p11, %p3540_p5  ;;  %p3323_p2 = por %p3322_p1, %p3321_p0 }
 0xfad   : > { %p3317_p13 = pneg %p3316_p12 }
 0xfae   : > { %v2208_v28 = vpop.f32.mrb[40].mxu1 }
 0xfaf   : > { %2331 = vrot.lane.b32.xlu1 %v2208_v28, %s4073_s29  ;;  %v3139_v29 = vpop.f32.mrb[41].mxu1  ;;  %p3324_p3 = pnand %p3323_p2, %p3317_p13 }
 0xfb0   : > { %v2211_v30 = vpop.f32.mrb[42].mxu1 }
 0xfb1   : > { %v3140_v31 = vpop.f32.mrb[43].mxu1 }
 0xfda   : > { %v2320_v33 = vpop.f32.mrb[44].mxu1 }
 0xfdb   : > { %2335 = vrot.lane.b32.xlu0 %v2320_v33, %s4074_s27  ;;  %v3151_v34 = vpop.f32.mrb[45].mxu1  ;;  %s3963_s27 = scalar_lea.hbm %s4075_s26, %s2903_s5 }
 0xfdc   : > { %v2323_v35 = vpop.f32.mrb[46].mxu1 }
 0xfdd   : > { %v3152_v36 = vpop.f32.mrb[47].mxu1 }
0x1019   : > { %v2328_v38 = vpop.permute.xlu0 %2327 }
0x101a   : > { %v2338_v40 = vsel %vm928_vm2, %v1981_v18, %v2328_v38 }
0x1021   : > { %v2332_v39 = vpop.permute.xlu1 %2331 }
0x1022   : > { %v2339_v41 = vsel %vm1388_vm4, %v2338_v40, %v2332_v39  ;;  %v3264_v40 = vld [vmem:[%s4025_s20] sm:$0xff]  }
0x104d   : > { %v2336_v42 = vpop.permute.xlu0 %2335 }
0x104e   : > { %v2340_v20 = vsel %vm1390_vm5, %v2339_v41, %v2336_v42  ;;  %v3265_v41 = vld [vmem:[%s4025_s20 + $0x8] sm:$0xff]  }
0x104f   : > { %v2341_v43 = vpack.c.bf16 %v2340_v20, %v2340_v20 }
0x1051   : > { %3158 = vmatmul.mubr.msk.bf16.vlgmr.msra.gmra.mrb[52].mxu0 %vm696_vm0, %v2341_v43 }
0x1052   : > { %3177 = vmatprep.mubr.msk.bf16.mxu0 %vm3379_vm1, %v3378_v9  ;;  %3170 = vmatpush3.bf16.msra.mxu0 %v3260_v5 }
0x1053   : > { %3171 = vmatprep.subr.bf16.mxu0 %v3378_v9 }
0x1056   : > { %3172 = vmatpush3.bf16.msra.mxu0 %v3261_v6 }
0x1057   : > { %3173 = vmatprep.subr.bf16.mxu0 %v3378_v9 }
0x105a   : > { %3174 = vmatpush3.bf16.msra.mxu0 %v3262_v7 }
0x105b   : > { %3175 = vmatprep.subr.bf16.mxu0 %v3378_v9 }
0x105e   : > { %3176 = vmatpush3.bf16.msra.mxu0 %v3263_v8 }
0x1124   : > { %v2404_v46 = vpop.f32.mrb[52].mxu0 }
0x1125   : > { %v2405_v47 = vadd.f32 %v2864_v45, %v2404_v46  ;;  %v3159_v48 = vpop.f32.mrb[53].mxu0  ;;  %v2898_v46 = vld [vmem:[%s4023_s18 + $0x1] ss:$0 sm:$0xff] }
0x1126   : > { %v2407_v49 = vpop.f32.mrb[54].mxu0 }
0x1127   : > { %v3160_v50 = vpop.f32.mrb[55].mxu0  ;;  %v2410_v56 = vadd.f32 %v2405_v47, %v3780_v37  ;;  %v3259_v37 = vld [vmem:[%s4019_s14 + $0x18] sm:$0xff]  }
0x1128   : > { %3164 = vmatpush3.bf16.msra.mxu1 %v3259_v37 }
0x1129   : > { %v2415_v51 = vsel %vm696_vm0, %v2410_v56, 0.0  ;;  %3181 = vmatprep.subr.bf16.mxu1 %v3378_v9 }
0x112a   : > { %2416 = vadd.xlane.f32.xlu1 %v2415_v51 }
0x11b7   : > { %v2417_v53 = vpop.xlane.xlu1 %2416 }
0x11b8   : > { %v2418_v54 = vmul.f32 0.03125, %v2417_v53 }
0x11ba   : > { %v2419_v55 = vsub.f32 %v2410_v56, %v2418_v54  ;;  %v2642_v56 = vld [vmem:[%s4026_s21] sm:$0x1] }
0x11bc   : > { %v2420_v57 = vmul.f32 %v2419_v55, %v2419_v55 }
0x11be   : > { %v2421_v44 = vsel %vm696_vm0, %v2420_v57, 0.0 }
0x11bf   : > { %2422 = vadd.xlane.f32.xlu0 %v2421_v44 }
0x124c   : > { %v2423_v59 = vpop.xlane.xlu0 %2422 }
0x124d   : > { %v2424_v60 = vmul.f32 0.03125, %v2423_v59 }
0x124f   : > { %v2425_v61 = vadd.f32 1e-12, %v2424_v60 }
0x1251   : > { %3306 = vrsqrt.f32 %v2425_v61 }
0x125b   : > { %v3307_v62 = vpop.eup %3306 }
0x125c   : > { %v2427_v0 = vmul.f32 %v3307_v62, %v2419_v55 }
0x125e   : > { %v2434_v2 = vmul.f32 %v2870_v63, %v2427_v0 }
0x1260   : > { %v2441_v3 = vadd.f32 %v2871_v1, %v2434_v2 }
0x1262   : > { %v2442_v4 = vpack.c.bf16 %v2441_v3, %v2441_v3 }
0x1264   : > { %3166 = vmatmul.mubr.msk.bf16.vlgmr.msra.gmra.mrb[48].mxu1 %vm696_vm0, %v2442_v4 }
0x1265   : > { %3185 = vmatprep.mubr.msk.bf16.mxu1 %vm3379_vm1, %v3378_v9  ;;  %3182 = vmatpush3.bf16.msra.mxu1 %v3264_v40 }
0x1266   : > { %3183 = vmatprep.subr.bf16.mxu1 %v3378_v9  ;;  %v2899_v9 = vld [vmem:[%s4024_s19 + $0x1] ss:$0 sm:$0xff] }
0x1269   : > { %3184 = vmatpush3.bf16.msra.mxu1 %v3265_v41 }
0x1337   : > { %v2505_v10 = vpop.f32.mrb[48].mxu1 }
0x1338   : > { %v2506_v11 = vadd.f32 %v2877_v52, %v2505_v10  ;;  %v3167_v12 = vpop.f32.mrb[49].mxu1 }
0x1339   : > { %v2508_v13 = vpop.f32.mrb[50].mxu1 }
0x133a   : > { %v2511_v14 = vmul.f32 %v2506_v11, %v2506_v11  ;;  %v3168_v15 = vpop.f32.mrb[51].mxu1 }
0x133c   : > { %v2512_v16 = vmul.f32 %v2511_v14, %v2506_v11 }
0x133e   : > { %v2513_v17 = vmul.f32 0.044715, %v2512_v16 }
0x1340   : > { %v2514_v18 = vadd.f32 %v2513_v17, %v2506_v11 }
0x1342   : > { %v2515_v19 = vmul.f32 0.7978846, %v2514_v18 }
0x1344   : > { %3308 = vtanh.f32 %v2515_v19 }
0x134e   : > { %v3309_v21 = vpop.eup %3308 }
0x134f   : > { %v2517_v22 = vadd.f32 1.0, %v3309_v21 }
0x1351   : > { %v2518_v23 = vmul.f32 0.5, %v2517_v22 }
0x1353   : > { %v2519_v24 = vmul.f32 %v2518_v23, %v2506_v11 }
0x1355   : > { %v2520_v25 = vpack.c.bf16 %v2519_v24, %v2519_v24 }
0x1357   : > { %3178 = vmatmul.mubr.msk.bf16.vlgmr.msra.gmra.mrb[56].mxu0 %vm1605_vm6, %v2520_v25 }
0x142a   : > { %v2599_v27 = vpop.f32.mrb[56].mxu0 }
0x142b   : > { %v2600_v28 = vadd.f32 %v2890_v26, %v2599_v27  ;;  %v3179_v29 = vpop.f32.mrb[57].mxu0 }
0x142c   : > { %v2602_v30 = vpop.f32.mrb[58].mxu0 }
0x142d   : > { %v3180_v31 = vpop.f32.mrb[59].mxu0  ;;  %v2605_v32 = vadd.f32 %v2600_v28, %v2441_v3 }
0x142f   : > { %v2610_v33 = vsel %vm696_vm0, %v2605_v32, 0.0 }
0x1430   : > { %2611 = vadd.xlane.f32.xlu0 %v2610_v33 }
0x14bd   : > { %v2612_v34 = vpop.xlane.xlu0 %2611 }
0x14be   : > { %v2613_v35 = vmul.f32 0.03125, %v2612_v34 }
0x14c0   : > { %v2614_v36 = vsub.f32 %v2605_v32, %v2613_v35 }
0x14c2   : > { %v2615_v38 = vmul.f32 %v2614_v36, %v2614_v36 }
0x14c4   : > { %v2616_v39 = vsel %vm696_vm0, %v2615_v38, 0.0 }
0x14c5   : > { %2617 = vadd.xlane.f32.xlu1 %v2616_v39 }
0x1552   : > { %v2618_v42 = vpop.xlane.xlu1 %2617 }
0x1553   : > { %v2619_v20 = vmul.f32 0.03125, %v2618_v42 }
0x1555   : > { %v2620_v43 = vadd.f32 1e-12, %v2619_v20 }
0x1557   : > { %3310 = vrsqrt.f32 %v2620_v43 }
0x1561   : > { %v3311_v45 = vpop.eup %3310 }
0x1562   : > { %v2622_v47 = vmul.f32 %v3311_v45, %v2614_v36 }
0x1564   : > { %v2629_v48 = vmul.f32 %v2898_v46, %v2622_v47 }
0x1566   : > { %v2636_v49 = vadd.f32 %v2899_v9, %v2629_v48 }
0x1568   : > { %v2637_v50 = vpack.c.bf16 %v2636_v49, %v2636_v49 }
0x156a   : > { %3186 = vmatmul.mubr.msk.bf16.vlgmr.msra.gmra.mrb[52].mxu1 %vm696_vm0, %v2637_v50 }
0x163d   : > { %v2692_v51 = vpop.f32.mrb[52].mxu1 }
0x163e   : > { %v2693_v53 = vadd.f32 %v2692_v51, %v2642_v56  ;;  %v3187_v54 = vpop.f32.mrb[53].mxu1 }
0x163f   : > { %v2695_v55 = vpop.f32.mrb[54].mxu1 }
0x1640   : > { %3312 = vtanh.f32 %v2693_v53  ;;  %v3188_v57 = vpop.f32.mrb[55].mxu1 }
0x164a   : > { %v3313_v44 = vpop.eup %3312 }
0x164b   : > { %2700 = vst.msk [vmem:[%s684_s2] sm:$0x1] %vm2699_vm7, %v3313_v44 }
0x164c   : > { %3327 = shalt.err (!%p3324_p3)
}
0x164d   : > { %s3328_s0 = scalar_lea.hbm %s3963_s27, 16  ;;  %s3332_s29 = scalar_lea.hbm %s4075_s26, 32 }
0x164e   : > { %p3329_p4 = scmp.ne.s32.totalorder %s3963_s27, %s3328_s0  ;;  %p3333_p9 = scmp.lt.u32.totalorder %s3963_s27, %s4075_s26 }
0x164f   : > { %p3334_p10 = scmp.lt.u32.totalorder %s3332_s29, %s3328_s0  ;;  %p3336_p12 = scmp.lt.u32.totalorder %s3328_s0, %s3963_s27 }
0x1650   : > { %p3330_p7 = pnand %p3329_p4, %p3540_p5 }
0x1651   : > { %p3335_p11 = por %p3334_p10, %p3333_p9 }
0x1652   : > { %p3331_p8 = pneg %p3330_p7 }
0x1653   : > { %p3337_p13 = por %p3336_p12, %p3335_p11 }
0x1655   : > { %p3338_p0 = pnand %p3337_p13, %p3331_p8 }
0x1657   : > { %3341 = shalt.err (!%p3338_p0)
}
0x1658   : > { %3189 = dma.vmem_to_hbm [thread:$0]  (%p3540_p5), %s3965_s24, 16, %s3963_s27, %s2702_s1  }
0x1659 PF: > { %s4076_s8 = sld [smem:[#allocation7_spill]]  ;;  %s4077_s3 = sld [smem:[#allocation5_spill]] }
0x165f   : > { %p3195_p1 = scmp.ge.s32.totalorder %s4076_s8, 2  ;;  %s2726_s5 = sand.u32 1, %s4077_s3  }
0x1660   : > { %s2727_s2 = scalar_lea.sflag [#allocation3], %s2726_s5 }
0x1661   : > { %p3192_p2 = pnand %p3195_p1, %p3544_p6 }
0x1663   : > { %3359 = dma.done.wait (!%p3192_p2), %s2727_s2, 16  }
0x1664   : > { %3361 = vsyncadd (!%p3192_p2), %s2727_s2, 4294967280  ;;  %s4079_s30 = sld [smem:[#allocation8_spill]]  ;;  %s4080_s0 = sld [smem:[#allocation6_spill]] }
0x1665   : > { %s4081_s29 = sld [smem:[#allocation9_spill]]  ;;  %s4082_s3 = smov %s3368_s28 }
0x166a   : > { %p32_p3 = scmp.ge.s32.totalorder %s4079_s30, 4   ;;  %s4083_s28 = smov %s4080_s0 }
0x166c   :  { %34 = sbr.rel (!%p32_p3) target bundleno = 14 (0xe), region = 162 }
0x1673   :  { %2731 = vsyncpa [#allocation3], 1 }
0x1674   :  { %2733 = vsyncpa [#allocation3 + $0x1], 1 }

</bundles_post_ra>
